<compile_context>
chip_gen: v7x
topology: tpu7x:2x2x1
jax: 0.10.0
libtpu: 0.0.40
codegen_flags: <defaults>
</compile_context>

<pallas_src>
import functools

import jax
import jax.numpy as jnp
from jax.experimental import pallas as pl
from jax.experimental.pallas import tpu as pltpu


LN_EPS = 1e-12
NEG_INF = -1e30


@functools.lru_cache(maxsize=None)
def _vmem_limit_bytes():
    """Per-generation VMEM budget: ~36 MiB on 64-MiB parts (v7x), 64 MiB on 128-MiB parts."""
    cap = 128 * 1024 * 1024
    try:
        cap = int(pltpu.get_tpu_info().vmem_capacity_bytes)
    except Exception:
        pass
    if cap <= 64 * 1024 * 1024:
        return 36 * 1024 * 1024
    return 64 * 1024 * 1024


def _row_tile(n):
    """Largest row tile (<=512 on 128-MiB parts, <=256 on 64-MiB parts) dividing n."""
    cap = 512 if _vmem_limit_bytes() > 40 * 1024 * 1024 else 256
    for t in (cap, 256, 128, 64, 32, 16, 8):
        if t <= n and n % t == 0:
            return t
    return n


def _col_tile(vp):
    """Largest lane-multiple vocab tile (<=512) dividing the padded vocab width."""
    for t in (512, 384, 256, 128):
        if vp % t == 0:
            return t
    return vp


# ---------------------------------------------------------------------------
# In-kernel helpers
# ---------------------------------------------------------------------------

def _layernorm(x, g, b):
    mu = jnp.mean(x, axis=-1, keepdims=True)
    var = jnp.mean(jnp.square(x - mu), axis=-1, keepdims=True)
    return (x - mu) * jax.lax.rsqrt(var + LN_EPS) * g + b


# ---------------------------------------------------------------------------
# Kernels
# ---------------------------------------------------------------------------

def layer_kernel(h_ref, g1_ref, b1_ref, wqkv_ref, bqkv_ref, wo_ref, bo_ref,
                 g2_ref, b2_ref, w1_ref, bf1_ref, w2_ref, bf2_ref, out_ref,
                 *, num_heads, scale):
    """One full transformer layer for one batch element: (1, S, E) bf16 in/out."""
    seq = h_ref.shape[1]
    e = h_ref.shape[2]
    hd = e // num_heads

    # --- LayerNorm 1 (f32 math) + fused QKV projection (bf16 MXU, f32 accumulate) ---
    h = h_ref[0].astype(jnp.float32)                                # (S, E)
    hn = _layernorm(h, g1_ref[...], b1_ref[...])
    qkv = jnp.dot(hn.astype(jnp.bfloat16), wqkv_ref[...],
                  preferred_element_type=jnp.float32) + bqkv_ref[...]   # (S, 3E)

    # --- Multi-head causal self-attention, heads handled in-kernel ------------------
    row = jax.lax.broadcasted_iota(jnp.int32, (seq, seq), 0)
    col = jax.lax.broadcasted_iota(jnp.int32, (seq, seq), 1)
    causal = col > row

    # Residual on the *normalized* input + out-proj bias; the head loop accumulates
    # ctx_h @ W_out[h*hd:(h+1)*hd, :] directly, fusing the head merge into the
    # out-projection (no concat, no lane-sparse (S, hd) stores, no XLA transposes).
    # TODO(synk): for realistic S this should become a flash-style online-softmax over
    #             K/V tiles; the full (S, S) score block is fine at the demo seq length.
    acc = hn + bo_ref[...]                                          # (S, E) f32
    for hh in range(num_heads):
        q = qkv[:, hh * hd:(hh + 1) * hd]
        k = qkv[:, e + hh * hd:e + (hh + 1) * hd]
        v = qkv[:, 2 * e + hh * hd:2 * e + (hh + 1) * hd]
        s = jax.lax.dot_general(
            q.astype(jnp.bfloat16), k.astype(jnp.bfloat16),
            (((1,), (1,)), ((), ())), preferred_element_type=jnp.float32) * scale
        s = jnp.where(causal, NEG_INF, s)                           # causal mask
        m = jnp.max(s, axis=-1, keepdims=True)
        p = jnp.exp(s - m)
        p = p * pl.reciprocal(jnp.sum(p, axis=-1, keepdims=True), approx=True)
        ctx_h = jnp.dot(p.astype(jnp.bfloat16), v.astype(jnp.bfloat16),
                        preferred_element_type=jnp.float32)         # (S, hd)
        acc = acc + jnp.dot(ctx_h.astype(jnp.bfloat16),
                            wo_ref[hh * hd:(hh + 1) * hd, :],
                            preferred_element_type=jnp.float32)     # (S, E)

    # --- LayerNorm 2 + FFN + residual (on the normalized input) ---------------------
    hn2 = _layernorm(acc, g2_ref[...], b2_ref[...])
    ff = jnp.maximum(jnp.dot(hn2.astype(jnp.bfloat16), w1_ref[...],
                             preferred_element_type=jnp.float32) + bf1_ref[...], 0.0)
    ff2 = jnp.dot(ff.astype(jnp.bfloat16), w2_ref[...],
                  preferred_element_type=jnp.float32) + bf2_ref[...]
    out_ref[0] = (ff2 + hn2).astype(out_ref.dtype)


def lm_head_kernel(h_ref, wt_ref, out_ref):
    # h_ref: (tm, E) bf16 ; wt_ref: (E, tn) bf16 (tied embedding table, transposed+padded)
    out_ref[...] = jnp.dot(h_ref[...], wt_ref[...],
                           preferred_element_type=jnp.float32)


# ---------------------------------------------------------------------------
# pallas_call wrappers
# ---------------------------------------------------------------------------

def layer_call(h, lp, *, num_heads):
    B, S, E = h.shape
    three_e = lp["w_qkv"].shape[1]
    H = lp["w1"].shape[1]
    hd = E // num_heads
    scale = float(hd) ** -0.5

    def inv(shape):
        # Grid-invariant full-array block: constant index_map => fetched from HBM once.
        return pl.BlockSpec(shape, lambda b: (0, 0))

    # TODO(synk): at realistic sizes on v7x (64 MiB VMEM) the resident weights should use
    # pipeline_mode=pl.Buffered(1) or be K-tiled with a VMEM accumulator to avoid the
    # default double-buffering doubling their footprint.
    return pl.pallas_call(
        functools.partial(layer_kernel, num_heads=num_heads, scale=scale),
        out_shape=jax.ShapeDtypeStruct((B, S, E), jnp.bfloat16),
        grid=(B,),
        in_specs=[
            pl.BlockSpec((1, S, E), lambda b: (b, 0, 0)),   # h (bf16 activations)
            inv((1, E)), inv((1, E)),                       # ln1 gamma / beta
            inv((E, three_e)), inv((1, three_e)),           # w_qkv / b_qkv
            inv((E, E)), inv((1, E)),                       # w_out / b_out
            inv((1, E)), inv((1, E)),                       # ln2 gamma / beta
            inv((E, H)), inv((1, H)),                       # w1 / b1
            inv((H, E)), inv((1, E)),                       # w2 / b2
        ],
        out_specs=pl.BlockSpec((1, S, E), lambda b: (b, 0, 0)),
        compiler_params=pltpu.CompilerParams(
            dimension_semantics=("parallel",),
            vmem_limit_bytes=_vmem_limit_bytes()),
    )(h, lp["ln1_g"], lp["ln1_b"], lp["w_qkv"], lp["b_qkv"],
      lp["w_out"], lp["b_out"], lp["ln2_g"], lp["ln2_b"],
      lp["w1"], lp["b1"], lp["w2"], lp["b2"])


def lm_head_call(h2d, lm_table_t):
    n, e = h2d.shape
    vp = lm_table_t.shape[1]
    tm = _row_tile(n)
    tn = _col_tile(vp)
    # Ensure >= 2 programs on the parallel grid where possible (v7x has 2 TensorCores).
    if (vp // tn) * (n // tm) < 2 and tm % 2 == 0 and tm // 2 >= 8 and n % (tm // 2) == 0:
        tm //= 2
    return pl.pallas_call(
        lm_head_kernel,
        out_shape=jax.ShapeDtypeStruct((n, vp), jnp.float32),
        # Vocab tile is the OUTER grid axis so the large (E, V_pad) tied weight is
        # streamed from HBM exactly once; the small (n, E) activation is re-read instead.
        grid=(vp // tn, n // tm),
        in_specs=[pl.BlockSpec((tm, e), lambda j, i: (i, 0)),
                  pl.BlockSpec((e, tn), lambda j, i: (0, j))],
        out_specs=pl.BlockSpec((tm, tn), lambda j, i: (i, j)),
        compiler_params=pltpu.CompilerParams(
            dimension_semantics=("parallel", "parallel"),
            vmem_limit_bytes=_vmem_limit_bytes()),
    )(h2d, lm_table_t)


# ---------------------------------------------------------------------------
# Parameters (deterministic, synthetic; Linear weights stored as (in, out) bf16)
# ---------------------------------------------------------------------------

def init_params(key, *, embed_dim, hidden_dim, num_embeddings, num_max_positions,
                num_layers):
    E, H, V, P = embed_dim, hidden_dim, num_embeddings, num_max_positions
    keys = jax.random.split(key, 2 + num_layers)
    scale = 0.02

    tok = scale * jax.random.normal(keys[0], (V, E), jnp.float32)
    pos = scale * jax.random.normal(keys[1], (P, E), jnp.float32)

    # Tied lm_head weight: transposed to (E, V) and padded to a lane-dense V.
    vp = ((V + 127) // 128) * 128
    lm_t = jnp.zeros((E, vp), jnp.float32).at[:, :V].set(tok.T).astype(jnp.bfloat16)

    params = {"tok_table": tok, "pos_table": pos, "lm_table_t": lm_t, "layers": []}
    for l in range(num_layers):
        k0, k1, k2, k3 = jax.random.split(keys[2 + l], 4)
        layer = dict(
            ln1_g=jnp.ones((1, E), jnp.float32),
            ln1_b=jnp.zeros((1, E), jnp.float32),
            w_qkv=(scale * jax.random.normal(k0, (E, 3 * E), jnp.float32)
                   ).astype(jnp.bfloat16),
            b_qkv=jnp.zeros((1, 3 * E), jnp.float32),
            w_out=(scale * jax.random.normal(k1, (E, E), jnp.float32)
                   ).astype(jnp.bfloat16),
            b_out=jnp.zeros((1, E), jnp.float32),
            ln2_g=jnp.ones((1, E), jnp.float32),
            ln2_b=jnp.zeros((1, E), jnp.float32),
            w1=(scale * jax.random.normal(k2, (E, H), jnp.float32)
                ).astype(jnp.bfloat16),
            b1=jnp.zeros((1, H), jnp.float32),
            w2=(scale * jax.random.normal(k3, (H, E), jnp.float32)
                ).astype(jnp.bfloat16),
            b2=jnp.zeros((1, E), jnp.float32),
        )
        params["layers"].append(layer)
    return params


# ---------------------------------------------------------------------------
# Full forward
# ---------------------------------------------------------------------------

def transformer_lm_forward(x_tokens, params, *, num_heads):
    """x_tokens: int32 [S, B] -> logits f32 [S, B, V] (matches the PyTorch module)."""
    S, B = x_tokens.shape
    V, E = params["tok_table"].shape

    # Embedding: XLA-side gather + positional add (replaces the serial in-kernel
    # per-row gather, per perf review); cast to bf16 = cross-kernel activation format.
    ids_bs = x_tokens.T.astype(jnp.int32)                                 # (B, S)
    h = params["tok_table"][ids_bs] + params["pos_table"][:S][None, :, :]  # (B, S, E) f32
    h = h.astype(jnp.bfloat16)
    # TODO(synk): training-mode dropout not implemented (eval semantics: identity).

    for lp in params["layers"]:
        h = layer_call(h, lp, num_heads=num_heads)                        # (B, S, E) bf16

    logits_p = lm_head_call(h.reshape(B * S, E), params["lm_table_t"])    # (N, V_pad) f32
    logits = logits_p[:, :V].reshape(B, S, V).transpose(1, 0, 2)          # (S, B, V)
    return logits


# ---------------------------------------------------------------------------
# Main
# ---------------------------------------------------------------------------

if __name__ == "__main__":
    embed_dim = 128          # lane-friendly (multiple of 128) per perf review
    hidden_dim = 256
    num_embeddings = 50
    num_max_positions = 16
    num_heads = 4
    num_layers = 2
    seq_len = 8
    batch = 2

    key = jax.random.PRNGKey(0)
    pkey, xkey = jax.random.split(key)

    params = init_params(pkey,
                         embed_dim=embed_dim,
                         hidden_dim=hidden_dim,
                         num_embeddings=num_embeddings,
                         num_max_positions=num_max_positions,
                         num_layers=num_layers)

    # Input has shape [seq length, batch] of token ids, as in the PyTorch module.
    x = jax.random.randint(xkey, (seq_len, batch), 0, num_embeddings, dtype=jnp.int32)

    fwd = jax.jit(functools.partial(transformer_lm_forward, num_heads=num_heads))
    logits = fwd(x, params)
    logits = jax.block_until_ready(logits)

    assert logits.shape == (seq_len, batch, num_embeddings)
    assert logits.dtype == jnp.float32
    assert bool(jnp.all(jnp.isfinite(logits)))
    print("KERNEL_OK")
</pallas_src>

<mosaic_0001>
module attributes {stable_mosaic.version = 11 : i64} {
  func.func @layer_kernel(%arg0: i32, %arg1: memref<1x8x128xbf16, #tpu.memory_space<vmem>>, %arg2: memref<1x128xf32, #tpu.memory_space<vmem>>, %arg3: memref<1x128xf32, #tpu.memory_space<vmem>>, %arg4: memref<128x384xbf16, #tpu.memory_space<vmem>>, %arg5: memref<1x384xf32, #tpu.memory_space<vmem>>, %arg6: memref<128x128xbf16, #tpu.memory_space<vmem>>, %arg7: memref<1x128xf32, #tpu.memory_space<vmem>>, %arg8: memref<1x128xf32, #tpu.memory_space<vmem>>, %arg9: memref<1x128xf32, #tpu.memory_space<vmem>>, %arg10: memref<128x256xbf16, #tpu.memory_space<vmem>>, %arg11: memref<1x256xf32, #tpu.memory_space<vmem>>, %arg12: memref<256x128xbf16, #tpu.memory_space<vmem>>, %arg13: memref<1x128xf32, #tpu.memory_space<vmem>>, %arg14: memref<1x8x128xbf16, #tpu.memory_space<vmem>>) attributes {dimension_semantics = [#tpu.dimension_semantics<parallel>], iteration_bounds = array<i64: 2>, scalar_prefetch = 0 : i64, scratch_operands = 0 : i64, tpu.core_type = #tpu.core_type<tc>, window_params = [{transform_indices = @transform_0, window_bounds = array<i64: 1, 8, 128>}, {pipeline_mode = #tpu.pipeline_mode<synchronous>, transform_indices = @transform_1, window_bounds = array<i64: 1, 128>}, {pipeline_mode = #tpu.pipeline_mode<synchronous>, transform_indices = @transform_2, window_bounds = array<i64: 1, 128>}, {pipeline_mode = #tpu.pipeline_mode<synchronous>, transform_indices = @transform_3, window_bounds = array<i64: 128, 384>}, {pipeline_mode = #tpu.pipeline_mode<synchronous>, transform_indices = @transform_4, window_bounds = array<i64: 1, 384>}, {pipeline_mode = #tpu.pipeline_mode<synchronous>, transform_indices = @transform_5, window_bounds = array<i64: 128, 128>}, {pipeline_mode = #tpu.pipeline_mode<synchronous>, transform_indices = @transform_6, window_bounds = array<i64: 1, 128>}, {pipeline_mode = #tpu.pipeline_mode<synchronous>, transform_indices = @transform_7, window_bounds = array<i64: 1, 128>}, {pipeline_mode = #tpu.pipeline_mode<synchronous>, transform_indices = @transform_8, window_bounds = array<i64: 1, 128>}, {pipeline_mode = #tpu.pipeline_mode<synchronous>, transform_indices = @transform_9, window_bounds = array<i64: 128, 256>}, {pipeline_mode = #tpu.pipeline_mode<synchronous>, transform_indices = @transform_10, window_bounds = array<i64: 1, 256>}, {pipeline_mode = #tpu.pipeline_mode<synchronous>, transform_indices = @transform_11, window_bounds = array<i64: 256, 128>}, {pipeline_mode = #tpu.pipeline_mode<synchronous>, transform_indices = @transform_12, window_bounds = array<i64: 1, 128>}, {transform_indices = @transform_13, window_bounds = array<i64: 1, 8, 128>}]} {
    %c0 = arith.constant 0 : index
    %c0_0 = arith.constant 0 : index
    %c0_1 = arith.constant 0 : index
    %0 = vector.load %arg1[%c0, %c0_0, %c0_1] : memref<1x8x128xbf16, #tpu.memory_space<vmem>>, vector<1x8x128xbf16>
    %1 = vector.shape_cast %0 : vector<1x8x128xbf16> to vector<8x128xbf16>
    %2 = arith.extf %1 : vector<8x128xbf16> to vector<8x128xf32>
    %c0_2 = arith.constant 0 : index
    %c0_3 = arith.constant 0 : index
    %3 = vector.load %arg2[%c0_2, %c0_3] : memref<1x128xf32, #tpu.memory_space<vmem>>, vector<1x128xf32>
    %c0_4 = arith.constant 0 : index
    %c0_5 = arith.constant 0 : index
    %4 = vector.load %arg3[%c0_4, %c0_5] : memref<1x128xf32, #tpu.memory_space<vmem>>, vector<1x128xf32>
    %cst = arith.constant dense<0.000000e+00> : vector<8xf32>
    %5 = vector.multi_reduction <add>, %2, %cst [1] : vector<8x128xf32> to vector<8xf32>
    %6 = vector.shape_cast %5 : vector<8xf32> to vector<8x1xf32>
    %cst_6 = arith.constant 1.280000e+02 : f32
    %7 = vector.broadcast %cst_6 : f32 to vector<8x1xf32>
    %8 = arith.divf %6, %7 : vector<8x1xf32>
    %9 = vector.broadcast %8 : vector<8x1xf32> to vector<8x128xf32>
    %10 = arith.subf %2, %9 : vector<8x128xf32>
    %11 = arith.mulf %10, %10 : vector<8x128xf32>
    %cst_7 = arith.constant dense<0.000000e+00> : vector<8xf32>
    %12 = vector.multi_reduction <add>, %11, %cst_7 [1] : vector<8x128xf32> to vector<8xf32>
    %13 = vector.shape_cast %12 : vector<8xf32> to vector<8x1xf32>
    %cst_8 = arith.constant 1.280000e+02 : f32
    %14 = vector.broadcast %cst_8 : f32 to vector<8x1xf32>
    %15 = arith.divf %13, %14 : vector<8x1xf32>
    %16 = vector.broadcast %8 : vector<8x1xf32> to vector<8x128xf32>
    %17 = arith.subf %2, %16 : vector<8x128xf32>
    %cst_9 = arith.constant 9.99999996E-13 : f32
    %18 = vector.broadcast %cst_9 : f32 to vector<8x1xf32>
    %19 = arith.addf %15, %18 : vector<8x1xf32>
    %20 = math.rsqrt %19 : vector<8x1xf32>
    %21 = vector.broadcast %20 : vector<8x1xf32> to vector<8x128xf32>
    %22 = arith.mulf %17, %21 : vector<8x128xf32>
    %23 = vector.broadcast %3 : vector<1x128xf32> to vector<8x128xf32>
    %24 = arith.mulf %22, %23 : vector<8x128xf32>
    %25 = vector.broadcast %4 : vector<1x128xf32> to vector<8x128xf32>
    %26 = arith.addf %24, %25 : vector<8x128xf32>
    %27 = arith.truncf %26 : vector<8x128xf32> to vector<8x128xbf16>
    %c0_10 = arith.constant 0 : index
    %c0_11 = arith.constant 0 : index
    %28 = vector.load %arg4[%c0_10, %c0_11] : memref<128x384xbf16, #tpu.memory_space<vmem>>, vector<128x384xbf16>
    %cst_12 = arith.constant dense<0.000000e+00> : vector<8x384xf32>
    %29 = tpu.matmul %27, %28, %cst_12 {dimension_numbers = #tpu.dot_dimension_numbers<[1], [0], [0], [1], [0, 0, 1, 1], [], []>} : vector<8x128xbf16>, vector<128x384xbf16>, vector<8x384xf32> -> vector<8x384xf32>
    %c0_13 = arith.constant 0 : index
    %c0_14 = arith.constant 0 : index
    %30 = vector.load %arg5[%c0_13, %c0_14] : memref<1x384xf32, #tpu.memory_space<vmem>>, vector<1x384xf32>
    %31 = vector.broadcast %30 : vector<1x384xf32> to vector<8x384xf32>
    %32 = arith.addf %29, %31 : vector<8x384xf32>
    %33 = tpu.iota {dimensions = array<i32: 0>} : vector<8x8xi32>
    %34 = tpu.iota {dimensions = array<i32: 1>} : vector<8x8xi32>
    %35 = arith.cmpi sgt, %34, %33 : vector<8x8xi32>
    %c0_15 = arith.constant 0 : index
    %c0_16 = arith.constant 0 : index
    %36 = vector.load %arg7[%c0_15, %c0_16] : memref<1x128xf32, #tpu.memory_space<vmem>>, vector<1x128xf32>
    %37 = vector.broadcast %36 : vector<1x128xf32> to vector<8x128xf32>
    %38 = arith.addf %26, %37 : vector<8x128xf32>
    %39 = vector.extract_strided_slice %32 {offsets = [0, 0], sizes = [8, 32], strides = [1, 1]} : vector<8x384xf32> to vector<8x32xf32>
    %40 = vector.extract_strided_slice %32 {offsets = [0, 128], sizes = [8, 32], strides = [1, 1]} : vector<8x384xf32> to vector<8x32xf32>
    %41 = vector.extract_strided_slice %32 {offsets = [0, 256], sizes = [8, 32], strides = [1, 1]} : vector<8x384xf32> to vector<8x32xf32>
    %42 = arith.truncf %39 : vector<8x32xf32> to vector<8x32xbf16>
    %43 = arith.truncf %40 : vector<8x32xf32> to vector<8x32xbf16>
    %cst_17 = arith.constant dense<0.000000e+00> : vector<8x8xf32>
    %44 = tpu.matmul %42, %43, %cst_17 {dimension_numbers = #tpu.dot_dimension_numbers<[1], [1], [0], [0], [0, 0, 1, 0], [], []>} : vector<8x32xbf16>, vector<8x32xbf16>, vector<8x8xf32> -> vector<8x8xf32>
    %cst_18 = arith.constant 0.176776692 : f32
    %45 = vector.broadcast %cst_18 : f32 to vector<8x8xf32>
    %46 = arith.mulf %44, %45 : vector<8x8xf32>
    %cst_19 = arith.constant -1.000000e+30 : f32
    %47 = vector.broadcast %cst_19 : f32 to vector<8x8xf32>
    %48 = arith.select %35, %47, %46 : vector<8x8xi1>, vector<8x8xf32>
    %cst_20 = arith.constant dense<0xFF800000> : vector<8xf32>
    %49 = vector.multi_reduction <maximumf>, %48, %cst_20 [1] : vector<8x8xf32> to vector<8xf32>
    %50 = vector.shape_cast %49 : vector<8xf32> to vector<8x1xf32>
    %51 = vector.broadcast %50 : vector<8x1xf32> to vector<8x8xf32>
    %52 = arith.subf %48, %51 : vector<8x8xf32>
    %53 = math.exp %52 : vector<8x8xf32>
    %cst_21 = arith.constant dense<0.000000e+00> : vector<8xf32>
    %54 = vector.multi_reduction <add>, %53, %cst_21 [1] : vector<8x8xf32> to vector<8xf32>
    %55 = vector.shape_cast %54 : vector<8xf32> to vector<8x1xf32>
    %56 = tpu.reciprocal %55 {approx = true} : vector<8x1xf32> -> vector<8x1xf32>
    %57 = vector.broadcast %56 : vector<8x1xf32> to vector<8x8xf32>
    %58 = arith.mulf %53, %57 : vector<8x8xf32>
    %59 = arith.truncf %58 : vector<8x8xf32> to vector<8x8xbf16>
    %60 = arith.truncf %41 : vector<8x32xf32> to vector<8x32xbf16>
    %cst_22 = arith.constant dense<0.000000e+00> : vector<8x32xf32>
    %61 = tpu.matmul %59, %60, %cst_22 {dimension_numbers = #tpu.dot_dimension_numbers<[1], [0], [0], [1], [0, 0, 1, 1], [], []>} : vector<8x8xbf16>, vector<8x32xbf16>, vector<8x32xf32> -> vector<8x32xf32>
    %62 = arith.truncf %61 : vector<8x32xf32> to vector<8x32xbf16>
    %c0_23 = arith.constant 0 : index
    %c0_24 = arith.constant 0 : index
    %63 = vector.load %arg6[%c0_23, %c0_24] : memref<128x128xbf16, #tpu.memory_space<vmem>>, vector<32x128xbf16>
    %cst_25 = arith.constant dense<0.000000e+00> : vector<8x128xf32>
    %64 = tpu.matmul %62, %63, %cst_25 {dimension_numbers = #tpu.dot_dimension_numbers<[1], [0], [0], [1], [0, 0, 1, 1], [], []>} : vector<8x32xbf16>, vector<32x128xbf16>, vector<8x128xf32> -> vector<8x128xf32>
    %65 = arith.addf %38, %64 : vector<8x128xf32>
    %66 = vector.extract_strided_slice %32 {offsets = [0, 32], sizes = [8, 32], strides = [1, 1]} : vector<8x384xf32> to vector<8x32xf32>
    %67 = vector.extract_strided_slice %32 {offsets = [0, 160], sizes = [8, 32], strides = [1, 1]} : vector<8x384xf32> to vector<8x32xf32>
    %68 = vector.extract_strided_slice %32 {offsets = [0, 288], sizes = [8, 32], strides = [1, 1]} : vector<8x384xf32> to vector<8x32xf32>
    %69 = arith.truncf %66 : vector<8x32xf32> to vector<8x32xbf16>
    %70 = arith.truncf %67 : vector<8x32xf32> to vector<8x32xbf16>
    %cst_26 = arith.constant dense<0.000000e+00> : vector<8x8xf32>
    %71 = tpu.matmul %69, %70, %cst_26 {dimension_numbers = #tpu.dot_dimension_numbers<[1], [1], [0], [0], [0, 0, 1, 0], [], []>} : vector<8x32xbf16>, vector<8x32xbf16>, vector<8x8xf32> -> vector<8x8xf32>
    %cst_27 = arith.constant 0.176776692 : f32
    %72 = vector.broadcast %cst_27 : f32 to vector<8x8xf32>
    %73 = arith.mulf %71, %72 : vector<8x8xf32>
    %cst_28 = arith.constant -1.000000e+30 : f32
    %74 = vector.broadcast %cst_28 : f32 to vector<8x8xf32>
    %75 = arith.select %35, %74, %73 : vector<8x8xi1>, vector<8x8xf32>
    %cst_29 = arith.constant dense<0xFF800000> : vector<8xf32>
    %76 = vector.multi_reduction <maximumf>, %75, %cst_29 [1] : vector<8x8xf32> to vector<8xf32>
    %77 = vector.shape_cast %76 : vector<8xf32> to vector<8x1xf32>
    %78 = vector.broadcast %77 : vector<8x1xf32> to vector<8x8xf32>
    %79 = arith.subf %75, %78 : vector<8x8xf32>
    %80 = math.exp %79 : vector<8x8xf32>
    %cst_30 = arith.constant dense<0.000000e+00> : vector<8xf32>
    %81 = vector.multi_reduction <add>, %80, %cst_30 [1] : vector<8x8xf32> to vector<8xf32>
    %82 = vector.shape_cast %81 : vector<8xf32> to vector<8x1xf32>
    %83 = tpu.reciprocal %82 {approx = true} : vector<8x1xf32> -> vector<8x1xf32>
    %84 = vector.broadcast %83 : vector<8x1xf32> to vector<8x8xf32>
    %85 = arith.mulf %80, %84 : vector<8x8xf32>
    %86 = arith.truncf %85 : vector<8x8xf32> to vector<8x8xbf16>
    %87 = arith.truncf %68 : vector<8x32xf32> to vector<8x32xbf16>
    %cst_31 = arith.constant dense<0.000000e+00> : vector<8x32xf32>
    %88 = tpu.matmul %86, %87, %cst_31 {dimension_numbers = #tpu.dot_dimension_numbers<[1], [0], [0], [1], [0, 0, 1, 1], [], []>} : vector<8x8xbf16>, vector<8x32xbf16>, vector<8x32xf32> -> vector<8x32xf32>
    %89 = arith.truncf %88 : vector<8x32xf32> to vector<8x32xbf16>
    %c32 = arith.constant 32 : index
    %c0_32 = arith.constant 0 : index
    %90 = vector.load %arg6[%c32, %c0_32] : memref<128x128xbf16, #tpu.memory_space<vmem>>, vector<32x128xbf16>
    %cst_33 = arith.constant dense<0.000000e+00> : vector<8x128xf32>
    %91 = tpu.matmul %89, %90, %cst_33 {dimension_numbers = #tpu.dot_dimension_numbers<[1], [0], [0], [1], [0, 0, 1, 1], [], []>} : vector<8x32xbf16>, vector<32x128xbf16>, vector<8x128xf32> -> vector<8x128xf32>
    %92 = arith.addf %65, %91 : vector<8x128xf32>
    %93 = vector.extract_strided_slice %32 {offsets = [0, 64], sizes = [8, 32], strides = [1, 1]} : vector<8x384xf32> to vector<8x32xf32>
    %94 = vector.extract_strided_slice %32 {offsets = [0, 192], sizes = [8, 32], strides = [1, 1]} : vector<8x384xf32> to vector<8x32xf32>
    %95 = vector.extract_strided_slice %32 {offsets = [0, 320], sizes = [8, 32], strides = [1, 1]} : vector<8x384xf32> to vector<8x32xf32>
    %96 = arith.truncf %93 : vector<8x32xf32> to vector<8x32xbf16>
    %97 = arith.truncf %94 : vector<8x32xf32> to vector<8x32xbf16>
    %cst_34 = arith.constant dense<0.000000e+00> : vector<8x8xf32>
    %98 = tpu.matmul %96, %97, %cst_34 {dimension_numbers = #tpu.dot_dimension_numbers<[1], [1], [0], [0], [0, 0, 1, 0], [], []>} : vector<8x32xbf16>, vector<8x32xbf16>, vector<8x8xf32> -> vector<8x8xf32>
    %cst_35 = arith.constant 0.176776692 : f32
    %99 = vector.broadcast %cst_35 : f32 to vector<8x8xf32>
    %100 = arith.mulf %98, %99 : vector<8x8xf32>
    %cst_36 = arith.constant -1.000000e+30 : f32
    %101 = vector.broadcast %cst_36 : f32 to vector<8x8xf32>
    %102 = arith.select %35, %101, %100 : vector<8x8xi1>, vector<8x8xf32>
    %cst_37 = arith.constant dense<0xFF800000> : vector<8xf32>
    %103 = vector.multi_reduction <maximumf>, %102, %cst_37 [1] : vector<8x8xf32> to vector<8xf32>
    %104 = vector.shape_cast %103 : vector<8xf32> to vector<8x1xf32>
    %105 = vector.broadcast %104 : vector<8x1xf32> to vector<8x8xf32>
    %106 = arith.subf %102, %105 : vector<8x8xf32>
    %107 = math.exp %106 : vector<8x8xf32>
    %cst_38 = arith.constant dense<0.000000e+00> : vector<8xf32>
    %108 = vector.multi_reduction <add>, %107, %cst_38 [1] : vector<8x8xf32> to vector<8xf32>
    %109 = vector.shape_cast %108 : vector<8xf32> to vector<8x1xf32>
    %110 = tpu.reciprocal %109 {approx = true} : vector<8x1xf32> -> vector<8x1xf32>
    %111 = vector.broadcast %110 : vector<8x1xf32> to vector<8x8xf32>
    %112 = arith.mulf %107, %111 : vector<8x8xf32>
    %113 = arith.truncf %112 : vector<8x8xf32> to vector<8x8xbf16>
    %114 = arith.truncf %95 : vector<8x32xf32> to vector<8x32xbf16>
    %cst_39 = arith.constant dense<0.000000e+00> : vector<8x32xf32>
    %115 = tpu.matmul %113, %114, %cst_39 {dimension_numbers = #tpu.dot_dimension_numbers<[1], [0], [0], [1], [0, 0, 1, 1], [], []>} : vector<8x8xbf16>, vector<8x32xbf16>, vector<8x32xf32> -> vector<8x32xf32>
    %116 = arith.truncf %115 : vector<8x32xf32> to vector<8x32xbf16>
    %c64 = arith.constant 64 : index
    %c0_40 = arith.constant 0 : index
    %117 = vector.load %arg6[%c64, %c0_40] : memref<128x128xbf16, #tpu.memory_space<vmem>>, vector<32x128xbf16>
    %cst_41 = arith.constant dense<0.000000e+00> : vector<8x128xf32>
    %118 = tpu.matmul %116, %117, %cst_41 {dimension_numbers = #tpu.dot_dimension_numbers<[1], [0], [0], [1], [0, 0, 1, 1], [], []>} : vector<8x32xbf16>, vector<32x128xbf16>, vector<8x128xf32> -> vector<8x128xf32>
    %119 = arith.addf %92, %118 : vector<8x128xf32>
    %120 = vector.extract_strided_slice %32 {offsets = [0, 96], sizes = [8, 32], strides = [1, 1]} : vector<8x384xf32> to vector<8x32xf32>
    %121 = vector.extract_strided_slice %32 {offsets = [0, 224], sizes = [8, 32], strides = [1, 1]} : vector<8x384xf32> to vector<8x32xf32>
    %122 = vector.extract_strided_slice %32 {offsets = [0, 352], sizes = [8, 32], strides = [1, 1]} : vector<8x384xf32> to vector<8x32xf32>
    %123 = arith.truncf %120 : vector<8x32xf32> to vector<8x32xbf16>
    %124 = arith.truncf %121 : vector<8x32xf32> to vector<8x32xbf16>
    %cst_42 = arith.constant dense<0.000000e+00> : vector<8x8xf32>
    %125 = tpu.matmul %123, %124, %cst_42 {dimension_numbers = #tpu.dot_dimension_numbers<[1], [1], [0], [0], [0, 0, 1, 0], [], []>} : vector<8x32xbf16>, vector<8x32xbf16>, vector<8x8xf32> -> vector<8x8xf32>
    %cst_43 = arith.constant 0.176776692 : f32
    %126 = vector.broadcast %cst_43 : f32 to vector<8x8xf32>
    %127 = arith.mulf %125, %126 : vector<8x8xf32>
    %cst_44 = arith.constant -1.000000e+30 : f32
    %128 = vector.broadcast %cst_44 : f32 to vector<8x8xf32>
    %129 = arith.select %35, %128, %127 : vector<8x8xi1>, vector<8x8xf32>
    %cst_45 = arith.constant dense<0xFF800000> : vector<8xf32>
    %130 = vector.multi_reduction <maximumf>, %129, %cst_45 [1] : vector<8x8xf32> to vector<8xf32>
    %131 = vector.shape_cast %130 : vector<8xf32> to vector<8x1xf32>
    %132 = vector.broadcast %131 : vector<8x1xf32> to vector<8x8xf32>
    %133 = arith.subf %129, %132 : vector<8x8xf32>
    %134 = math.exp %133 : vector<8x8xf32>
    %cst_46 = arith.constant dense<0.000000e+00> : vector<8xf32>
    %135 = vector.multi_reduction <add>, %134, %cst_46 [1] : vector<8x8xf32> to vector<8xf32>
    %136 = vector.shape_cast %135 : vector<8xf32> to vector<8x1xf32>
    %137 = tpu.reciprocal %136 {approx = true} : vector<8x1xf32> -> vector<8x1xf32>
    %138 = vector.broadcast %137 : vector<8x1xf32> to vector<8x8xf32>
    %139 = arith.mulf %134, %138 : vector<8x8xf32>
    %140 = arith.truncf %139 : vector<8x8xf32> to vector<8x8xbf16>
    %141 = arith.truncf %122 : vector<8x32xf32> to vector<8x32xbf16>
    %cst_47 = arith.constant dense<0.000000e+00> : vector<8x32xf32>
    %142 = tpu.matmul %140, %141, %cst_47 {dimension_numbers = #tpu.dot_dimension_numbers<[1], [0], [0], [1], [0, 0, 1, 1], [], []>} : vector<8x8xbf16>, vector<8x32xbf16>, vector<8x32xf32> -> vector<8x32xf32>
    %143 = arith.truncf %142 : vector<8x32xf32> to vector<8x32xbf16>
    %c96 = arith.constant 96 : index
    %c0_48 = arith.constant 0 : index
    %144 = vector.load %arg6[%c96, %c0_48] : memref<128x128xbf16, #tpu.memory_space<vmem>>, vector<32x128xbf16>
    %cst_49 = arith.constant dense<0.000000e+00> : vector<8x128xf32>
    %145 = tpu.matmul %143, %144, %cst_49 {dimension_numbers = #tpu.dot_dimension_numbers<[1], [0], [0], [1], [0, 0, 1, 1], [], []>} : vector<8x32xbf16>, vector<32x128xbf16>, vector<8x128xf32> -> vector<8x128xf32>
    %146 = arith.addf %119, %145 : vector<8x128xf32>
    %c0_50 = arith.constant 0 : index
    %c0_51 = arith.constant 0 : index
    %147 = vector.load %arg8[%c0_50, %c0_51] : memref<1x128xf32, #tpu.memory_space<vmem>>, vector<1x128xf32>
    %c0_52 = arith.constant 0 : index
    %c0_53 = arith.constant 0 : index
    %148 = vector.load %arg9[%c0_52, %c0_53] : memref<1x128xf32, #tpu.memory_space<vmem>>, vector<1x128xf32>
    %cst_54 = arith.constant dense<0.000000e+00> : vector<8xf32>
    %149 = vector.multi_reduction <add>, %146, %cst_54 [1] : vector<8x128xf32> to vector<8xf32>
    %150 = vector.shape_cast %149 : vector<8xf32> to vector<8x1xf32>
    %cst_55 = arith.constant 1.280000e+02 : f32
    %151 = vector.broadcast %cst_55 : f32 to vector<8x1xf32>
    %152 = arith.divf %150, %151 : vector<8x1xf32>
    %153 = vector.broadcast %152 : vector<8x1xf32> to vector<8x128xf32>
    %154 = arith.subf %146, %153 : vector<8x128xf32>
    %155 = arith.mulf %154, %154 : vector<8x128xf32>
    %cst_56 = arith.constant dense<0.000000e+00> : vector<8xf32>
    %156 = vector.multi_reduction <add>, %155, %cst_56 [1] : vector<8x128xf32> to vector<8xf32>
    %157 = vector.shape_cast %156 : vector<8xf32> to vector<8x1xf32>
    %cst_57 = arith.constant 1.280000e+02 : f32
    %158 = vector.broadcast %cst_57 : f32 to vector<8x1xf32>
    %159 = arith.divf %157, %158 : vector<8x1xf32>
    %160 = vector.broadcast %152 : vector<8x1xf32> to vector<8x128xf32>
    %161 = arith.subf %146, %160 : vector<8x128xf32>
    %cst_58 = arith.constant 9.99999996E-13 : f32
    %162 = vector.broadcast %cst_58 : f32 to vector<8x1xf32>
    %163 = arith.addf %159, %162 : vector<8x1xf32>
    %164 = math.rsqrt %163 : vector<8x1xf32>
    %165 = vector.broadcast %164 : vector<8x1xf32> to vector<8x128xf32>
    %166 = arith.mulf %161, %165 : vector<8x128xf32>
    %167 = vector.broadcast %147 : vector<1x128xf32> to vector<8x128xf32>
    %168 = arith.mulf %166, %167 : vector<8x128xf32>
    %169 = vector.broadcast %148 : vector<1x128xf32> to vector<8x128xf32>
    %170 = arith.addf %168, %169 : vector<8x128xf32>
    %171 = arith.truncf %170 : vector<8x128xf32> to vector<8x128xbf16>
    %c0_59 = arith.constant 0 : index
    %c0_60 = arith.constant 0 : index
    %172 = vector.load %arg10[%c0_59, %c0_60] : memref<128x256xbf16, #tpu.memory_space<vmem>>, vector<128x256xbf16>
    %cst_61 = arith.constant dense<0.000000e+00> : vector<8x256xf32>
    %173 = tpu.matmul %171, %172, %cst_61 {dimension_numbers = #tpu.dot_dimension_numbers<[1], [0], [0], [1], [0, 0, 1, 1], [], []>} : vector<8x128xbf16>, vector<128x256xbf16>, vector<8x256xf32> -> vector<8x256xf32>
    %c0_62 = arith.constant 0 : index
    %c0_63 = arith.constant 0 : index
    %174 = vector.load %arg11[%c0_62, %c0_63] : memref<1x256xf32, #tpu.memory_space<vmem>>, vector<1x256xf32>
    %175 = vector.broadcast %174 : vector<1x256xf32> to vector<8x256xf32>
    %176 = arith.addf %173, %175 : vector<8x256xf32>
    %cst_64 = arith.constant 0.000000e+00 : f32
    %177 = vector.broadcast %cst_64 : f32 to vector<8x256xf32>
    %178 = arith.maximumf %176, %177 : vector<8x256xf32>
    %179 = arith.truncf %178 : vector<8x256xf32> to vector<8x256xbf16>
    %c0_65 = arith.constant 0 : index
    %c0_66 = arith.constant 0 : index
    %180 = vector.load %arg12[%c0_65, %c0_66] : memref<256x128xbf16, #tpu.memory_space<vmem>>, vector<256x128xbf16>
    %cst_67 = arith.constant dense<0.000000e+00> : vector<8x128xf32>
    %181 = tpu.matmul %179, %180, %cst_67 {dimension_numbers = #tpu.dot_dimension_numbers<[1], [0], [0], [1], [0, 0, 1, 1], [], []>} : vector<8x256xbf16>, vector<256x128xbf16>, vector<8x128xf32> -> vector<8x128xf32>
    %c0_68 = arith.constant 0 : index
    %c0_69 = arith.constant 0 : index
    %182 = vector.load %arg13[%c0_68, %c0_69] : memref<1x128xf32, #tpu.memory_space<vmem>>, vector<1x128xf32>
    %183 = vector.broadcast %182 : vector<1x128xf32> to vector<8x128xf32>
    %184 = arith.addf %181, %183 : vector<8x128xf32>
    %185 = arith.addf %184, %170 : vector<8x128xf32>
    %186 = arith.truncf %185 : vector<8x128xf32> to vector<8x128xbf16>
    %c0_70 = arith.constant 0 : index
    %c0_71 = arith.constant 0 : index
    %c0_72 = arith.constant 0 : index
    %187 = vector.load %arg14[%c0_70, %c0_71, %c0_72] : memref<1x8x128xbf16, #tpu.memory_space<vmem>>, vector<1x8x128xbf16>
    %188 = vector.shape_cast %187 : vector<1x8x128xbf16> to vector<8x128xbf16>
    %189 = vector.shape_cast %186 : vector<8x128xbf16> to vector<1x8x128xbf16>
    tpu.vector_store %arg14[%c0_70, %c0_71, %c0_72], %189 {strides = array<i32>} : memref<1x8x128xbf16, #tpu.memory_space<vmem>>, vector<1x8x128xbf16>,
    return
  }
  func.func @transform_0(%arg0: i32) -> (i32, i32, i32) {
    %c0_i32 = arith.constant 0 : i32
    %c0_i32_0 = arith.constant 0 : i32
    %c0_i32_1 = arith.constant 0 : i32
    return %arg0, %c0_i32, %c0_i32_0 : i32, i32, i32
  }
  func.func @transform_1(%arg0: i32) -> (i32, i32) {
    %c0_i32 = arith.constant 0 : i32
    %c0_i32_0 = arith.constant 0 : i32
    %c0_i32_1 = arith.constant 0 : i32
    return %c0_i32, %c0_i32_0 : i32, i32
  }
  func.func @transform_2(%arg0: i32) -> (i32, i32) {
    %c0_i32 = arith.constant 0 : i32
    %c0_i32_0 = arith.constant 0 : i32
    %c0_i32_1 = arith.constant 0 : i32
    return %c0_i32, %c0_i32_0 : i32, i32
  }
  func.func @transform_3(%arg0: i32) -> (i32, i32) {
    %c0_i32 = arith.constant 0 : i32
    %c0_i32_0 = arith.constant 0 : i32
    %c0_i32_1 = arith.constant 0 : i32
    return %c0_i32, %c0_i32_0 : i32, i32
  }
  func.func @transform_4(%arg0: i32) -> (i32, i32) {
    %c0_i32 = arith.constant 0 : i32
    %c0_i32_0 = arith.constant 0 : i32
    %c0_i32_1 = arith.constant 0 : i32
    return %c0_i32, %c0_i32_0 : i32, i32
  }
  func.func @transform_5(%arg0: i32) -> (i32, i32) {
    %c0_i32 = arith.constant 0 : i32
    %c0_i32_0 = arith.constant 0 : i32
    %c0_i32_1 = arith.constant 0 : i32
    return %c0_i32, %c0_i32_0 : i32, i32
  }
  func.func @transform_6(%arg0: i32) -> (i32, i32) {
    %c0_i32 = arith.constant 0 : i32
    %c0_i32_0 = arith.constant 0 : i32
    %c0_i32_1 = arith.constant 0 : i32
    return %c0_i32, %c0_i32_0 : i32, i32
  }
  func.func @transform_7(%arg0: i32) -> (i32, i32) {
    %c0_i32 = arith.constant 0 : i32
    %c0_i32_0 = arith.constant 0 : i32
    %c0_i32_1 = arith.constant 0 : i32
    return %c0_i32, %c0_i32_0 : i32, i32
  }
  func.func @transform_8(%arg0: i32) -> (i32, i32) {
    %c0_i32 = arith.constant 0 : i32
    %c0_i32_0 = arith.constant 0 : i32
    %c0_i32_1 = arith.constant 0 : i32
    return %c0_i32, %c0_i32_0 : i32, i32
  }
  func.func @transform_9(%arg0: i32) -> (i32, i32) {
    %c0_i32 = arith.constant 0 : i32
    %c0_i32_0 = arith.constant 0 : i32
    %c0_i32_1 = arith.constant 0 : i32
    return %c0_i32, %c0_i32_0 : i32, i32
  }
  func.func @transform_10(%arg0: i32) -> (i32, i32) {
    %c0_i32 = arith.constant 0 : i32
    %c0_i32_0 = arith.constant 0 : i32
    %c0_i32_1 = arith.constant 0 : i32
    return %c0_i32, %c0_i32_0 : i32, i32
  }
  func.func @transform_11(%arg0: i32) -> (i32, i32) {
    %c0_i32 = arith.constant 0 : i32
    %c0_i32_0 = arith.constant 0 : i32
    %c0_i32_1 = arith.constant 0 : i32
    return %c0_i32, %c0_i32_0 : i32, i32
  }
  func.func @transform_12(%arg0: i32) -> (i32, i32) {
    %c0_i32 = arith.constant 0 : i32
    %c0_i32_0 = arith.constant 0 : i32
    %c0_i32_1 = arith.constant 0 : i32
    return %c0_i32, %c0_i32_0 : i32, i32
  }
  func.func @transform_13(%arg0: i32) -> (i32, i32, i32) {
    %c0_i32 = arith.constant 0 : i32
    %c0_i32_0 = arith.constant 0 : i32
    %c0_i32_1 = arith.constant 0 : i32
    return %arg0, %c0_i32, %c0_i32_0 : i32, i32, i32
  }
}

module attributes {stable_mosaic.version = 11 : i64} {
  func.func @lm_head_kernel(%arg0: i32, %arg1: i32, %arg2: memref<8x128xbf16, #tpu.memory_space<vmem>>, %arg3: memref<128x128xbf16, #tpu.memory_space<vmem>>, %arg4: memref<8x128xf32, #tpu.memory_space<vmem>>) attributes {dimension_semantics = [#tpu.dimension_semantics<parallel>, #tpu.dimension_semantics<parallel>], iteration_bounds = array<i64: 1, 2>, scalar_prefetch = 0 : i64, scratch_operands = 0 : i64, tpu.core_type = #tpu.core_type<tc>, window_params = [{transform_indices = @transform_0, window_bounds = array<i64: 8, 128>}, {transform_indices = @transform_1, window_bounds = array<i64: 128, 128>}, {transform_indices = @transform_2, window_bounds = array<i64: 8, 128>}]} {
    %c0 = arith.constant 0 : index
    %c0_0 = arith.constant 0 : index
    %0 = vector.load %arg2[%c0, %c0_0] : memref<8x128xbf16, #tpu.memory_space<vmem>>, vector<8x128xbf16>
    %c0_1 = arith.constant 0 : index
    %c0_2 = arith.constant 0 : index
    %1 = vector.load %arg3[%c0_1, %c0_2] : memref<128x128xbf16, #tpu.memory_space<vmem>>, vector<128x128xbf16>
    %cst = arith.constant dense<0.000000e+00> : vector<8x128xf32>
    %2 = tpu.matmul %0, %1, %cst {dimension_numbers = #tpu.dot_dimension_numbers<[1], [0], [0], [1], [0, 0, 1, 1], [], []>} : vector<8x128xbf16>, vector<128x128xbf16>, vector<8x128xf32> -> vector<8x128xf32>
    %c0_3 = arith.constant 0 : index
    %c0_4 = arith.constant 0 : index
    %3 = vector.load %arg4[%c0_3, %c0_4] : memref<8x128xf32, #tpu.memory_space<vmem>>, vector<8x128xf32>
    tpu.vector_store %arg4[%c0_3, %c0_4], %2 {strides = array<i32>} : memref<8x128xf32, #tpu.memory_space<vmem>>, vector<8x128xf32>,
    return
  }
  func.func @transform_0(%arg0: i32, %arg1: i32) -> (i32, i32) {
    %c0_i32 = arith.constant 0 : i32
    %c0_i32_0 = arith.constant 0 : i32
    return %arg1, %c0_i32 : i32, i32
  }
  func.func @transform_1(%arg0: i32, %arg1: i32) -> (i32, i32) {
    %c0_i32 = arith.constant 0 : i32
    %c0_i32_0 = arith.constant 0 : i32
    return %c0_i32, %arg0 : i32, i32
  }
  func.func @transform_2(%arg0: i32, %arg1: i32) -> (i32, i32) {
    %c0_i32 = arith.constant 0 : i32
    return %arg1, %arg0 : i32, i32
  }
}

</mosaic_0001>

<bundles_post_ra>
// kernel: transformer_lm_forward.5
= control target key start
LH: loop header
LB: loop body
LE: loop exit
PB: predicated region body
PF: predicated region fallthrough
CT: control target
= control target key end

     0   :  { %7 = vsyncpa [#allocation3], 0  ;;  %s931_s0 = inlined_call_operand.hbm [shape: bf16[16,128], index: 0, kind: input, shape index: {}]   ;;  %s932_s1 = inlined_call_operand.hbm [shape: bf16[128,128], index: 1, kind: input, shape index: {}]   ;;  %s933_s2 = inlined_call_operand.hbm [shape: f32[16,128], index: 2, kind: output, shape index: {}]  }
   0x1   :  { %9 = vsyncpa [#allocation3 + $0x1], 0 }
   0x2   :  { %10 = vsyncpa [#allocation6], 0 }
   0x3   :  { %11 = vsyncpa [#allocation4], 0 }
   0x4   :  { %13 = vsyncpa [#allocation4 + $0x1], 0  ;;  %s713_s9 = smov 0   ;;  %s715_s10 = smov 0  }
   0x5   :  { %s717_s11 = smov 0   ;;  %s719_s12 = smov 0  }
   0x6   :  { %s721_s13 = smov 0   ;;  %s723_s14 = smov 0  }
   0x7 LB: > { %s408_s15 = sadd.s32 4294967295, %s689_s14   ;;  %s409_s16 = sadd.s32 4294967294, %s689_s14   ;;  %s689_s14 = sphi %s723_s14, %s19_s14   ;;  %s685_s13 = sphi %s721_s13, %s957_s13   ;;  %s681_s12 = sphi %s719_s12, %s956_s12   ;;  %s677_s11 = sphi %s717_s11, %s955_s11   ;;  %s673_s10 = sphi %s715_s10, %s954_s10   ;;  %s669_s9 = sphi %s713_s9, %s953_s9  }
   0x8   : > { %p51_p0 = scmp.ne.s32.totalorder %s673_s10, %s669_s9  ;;  %p747_p1 = scmp.eq.s32.totalorder %s408_s15, 0 }
   0x9   : > { %p751_p2 = scmp.eq.s32.totalorder %s408_s15, 1  ;;  %p109_p3 = scmp.eq.s32.totalorder %s409_s16, 1 }
   0xa   : > { %s938_s17 = scalar_select %p747_p1, 1, 0 }
   0xb   : > { %s939_s18 = scalar_select %p751_p2, 1, 0 }
   0xc   : > { %p757_p4 = por %p747_p1, %p51_p0  ;;  %p410_p5 = scmp.ge.s32.totalorder %s689_s14, 1 }
   0xd   : > { %p762_p6 = por %p109_p3, %p51_p0  ;;  %p116_p7 = scmp.lt.s32.totalorder %s689_s14, 3 }
   0xe   : > { %s940_s19 = scalar_select %p757_p4, 1, 0 }
   0xf   : > { %s941_s20 = scalar_select %p762_p6, 1, 0 }
  0x10   : > { %p767_p8 = pnand %p410_p5, %p116_p7  ;;  %s691_s22 = smov [#allocation5]  }
  0x11   : > { %s130_s23 = sshll.u32 %s691_s22, 4  ;;  %s28_s25 = sadd.s32 1, %s685_s13  ;;  %s131_s23 = int_to_ptr.vmem [resolvable:$true] %s130_s23 }
  0x12   : > { %s942_s21 = scalar_select %p767_p8, 1, 0 }
  0x13   : > { %p468_p9 = pneg %p767_p8  ;;  %s545_s28 = scalar_lea.hbm %s932_s1, 1024 }
  0x14   : > { %p546_p12 = scmp.ne.s32.totalorder %s932_s1, %s545_s28  ;;  %p552_p5 = scmp.lt.u32.totalorder %s545_s28, %s932_s1 }
  0x15   : > { %p776_p11 = pnand %p468_p9, %p747_p1 }
  0x17   : > { %p547_p13 = pneg %p776_p11 }
  0x19   : > { %p548_p0 = pnand %p547_p13, %p546_p12 }
  0x1b   : > { %p549_p3 = pneg %p548_p0 }
  0x1d   : > { %p554_p7 = pnand %p552_p5, %p549_p3 }
  0x1f   : > { %557 = shalt.err (!%p554_p7)
}
  0x20   : > { %s558_s5 = scalar_lea.vmem %s131_s23, 1024  ;;  %p566_p1 = scmp.lt.s32.totalorder %s131_s23, %s131_s23 }
  0x21   : > { %p559_p9 = scmp.ne.s32.totalorder %s131_s23, %s558_s5  ;;  %p567_p4 = scmp.lt.s32.totalorder %s558_s5, %s558_s5 }
  0x23   : > { %p561_p10 = pnand %p559_p9, %p547_p13  ;;  %p568_p8 = por %p567_p4, %p566_p1 }
  0x25   : > { %p562_p6 = pneg %p561_p10 }
  0x27   : > { %p569_p2 = pnand %p568_p8, %p562_p6 }
  0x29   : > { %572 = shalt.err (!%p569_p2)
}
  0x2a   : > { %s692_s6 = smov 64   ;;  %s693_s7 = smov 4  }
  0x2b   : > { %471 = dma.hbm_to_vmem [thread:$0]  (!%p776_p11), %s932_s1, 1024, %s131_s23, [#allocation6], %s692_s6, %s692_s6, %s693_s7  }
  0x2c   : > { %p29_p1 = scmp.ge.s32.totalorder %s28_s25, 2  ;;  %s38_s16 = sadd.s32 1, %s677_s11 }
  0x2d   : > { %p45_p2 = scmp.ne.s32.totalorder %s677_s11, %s673_s10  ;;  %p46_p4 = scmp.eq.s32.totalorder %s689_s14, 0 }
  0x2e   : > { %s959_s25 = smov (%p29_p1, %s28_s25), 0  ;;  %p945_p8 = scmp.ne.s32.totalorder %s939_s18, 0 }
  0x2f   : > { %p803_p6 = por %p46_p4, %p45_p2  ;;  %s35_s24 = ssub.s32 %s685_s13, %s959_s25 }
  0x30   : > { %p809_p10 = por %p945_p8, %p45_p2  ;;  %p481_p12 = scmp.lt.s32.totalorder %s689_s14, 2 }
  0x31   : > { %p36_p11 = scmp.eq.s32.totalorder %s35_s24, 0  ;;  %s144_s23 = sand.u32 1, %s677_s11  }
  0x32   : > { %s413_s27 = sshll.u32 %s144_s23, 2  ;;  %s414_s29 = sshll.u32 %s685_s13, 6 }
  0x33   : > { %s818_s28 = scalar_select %p36_p11, %s677_s11, %s38_s16  }
  0x34   : > { %s824_s4 = scalar_lea.hbm %s931_s0, %s414_s29  ;;  %s148_s18 = scalar_lea.vmem [#allocation2], %s413_s27 }
  0x35   : > { %s155_s5 = sshll.u32 %s148_s18, 4  ;;  %p830_p13 = pnand %p481_p12, %p803_p6  ;;  %s826_s5 = int_to_ptr.vmem [resolvable:$true] %s155_s5 }
  0x36   : > { %s145_s7 = scalar_lea.sflag [#allocation3], %s144_s23  ;;  %s573_s8 = scalar_lea.hbm %s824_s4, 64 }
  0x37   : > { %p574_p0 = scmp.ne.s32.totalorder %s824_s4, %s573_s8  ;;  %p575_p3 = pneg %p830_p13 }
  0x38   : > { %s578_s24 = scalar_lea.hbm %s931_s0, 128  ;;  %p579_p9 = scmp.lt.u32.totalorder %s824_s4, %s931_s0 }
  0x39   : > { %p576_p5 = pnand %p575_p3, %p574_p0  ;;  %p580_p1 = scmp.lt.u32.totalorder %s578_s24, %s573_s8 }
  0x3a   : > { %p582_p4 = scmp.lt.u32.totalorder %s573_s8, %s824_s4 }
  0x3b   : > { %p577_p7 = pneg %p576_p5  ;;  %p581_p2 = por %p580_p1, %p579_p9 }
  0x3d   : > { %p583_p6 = por %p582_p4, %p581_p2 }
  0x3f   : > { %p584_p8 = pnand %p583_p6, %p577_p7 }
  0x41   : > { %587 = shalt.err (!%p584_p8)
}
  0x42   : > { %s588_s23 = scalar_lea.vmem %s826_s5, 64  ;;  %s694_s29 = smov [#allocation2]  }
  0x43   : > { %p589_p12 = scmp.ne.s32.totalorder %s826_s5, %s588_s23  ;;  %s593_s30 = sshll.u32 %s694_s29, 4  ;;  %s594_s30 = int_to_ptr.vmem [resolvable:$false] %s593_s30 }
  0x44   : > { %s595_s3 = scalar_lea.vmem %s594_s30, 128  ;;  %p596_p5 = scmp.lt.s32.totalorder %s826_s5, %s594_s30 }
  0x45   : > { %p591_p11 = pnand %p589_p12, %p575_p3  ;;  %p597_p9 = scmp.lt.s32.totalorder %s595_s3, %s588_s23 }
  0x47   : > { %p592_p0 = pneg %p591_p11  ;;  %p598_p1 = por %p597_p9, %p596_p5 }
  0x49   : > { %p599_p2 = pnand %p598_p1, %p592_p0 }
  0x4b   : > { %602 = shalt.err (!%p599_p2)
}
  0x4c   : > { %475 = dma.hbm_to_vmem [thread:$0]  (!%p830_p13), %s824_s4, 64, %s826_s5, %s145_s7  }
  0x4d   : > { %p948_p7 = scmp.ne.s32.totalorder %s942_s21, 0 }
  0x4e   : > { %s862_s18 = sand.u32 (!%p948_p7), 1, %s673_s10   ;;  %p949_p3 = scmp.ne.s32.totalorder (!%p948_p7), %s940_s19, 0 }
  0x4f   : > { %164 = sbr.rel (%p948_p7) target bundleno = 350 (0x15e), region = 28  ;;  %s416_s8 = sshll.u32 (!%p948_p7), %s862_s18, 2 }
  0x50   : > { %s167_s15 = scalar_lea.sflag (!%p948_p7), [#allocation3], %s862_s18  ;;  %s866_s16 = scalar_lea.vmem (!%p948_p7), [#allocation2], %s416_s8 }
  0x56   : > { %656 = dma.done.wait (%p949_p3), %s167_s15, 64  }
  0x57   : > { %658 = vsyncadd (%p949_p3), %s167_s15, 4294967232  ;;  %p950_p13 = scmp.ne.s32.totalorder %s938_s17, 0 }
  0x59   : > { %660 = dma.done.wait (%p950_p13), [#allocation6], 1024  }
  0x5a   : > { %662 = vsyncadd (%p950_p13), [#allocation6], 4294966272  ;;  %v695_v0 = vmov 0.0   ;;  %vm696_vm0 = vmmov 0   ;;  %v537_v1 = vld [vmem:[#allocation5] sm:$0xff]   ;;  %v538_v2 = vld [vmem:[#allocation5 + $0x8] sm:$0xff]  }
  0x5b   : > { %440 = vmatprep.subr.bf16.mxu0 %v695_v0  ;;  %456 = vmatprep.mubr.msk.bf16.mxu0 %vm696_vm0, %v695_v0  ;;  %v539_v3 = vld [vmem:[#allocation5 + $0x10] sm:$0xff]   ;;  %v540_v4 = vld [vmem:[#allocation5 + $0x18] sm:$0xff]   ;;  %v541_v5 = vld [vmem:[#allocation5 + $0x20] sm:$0xff]   ;;  %s418_s17 = sshll.u32 %s862_s18, 3  ;;  %s428_s4 = sshll.u32 %s681_s12, 7 }
  0x5c   : > { %441 = vmatpush3.bf16.msra.mxu0 %v537_v1  ;;  %v542_v6 = vld [vmem:[#allocation5 + $0x28] sm:$0xff]   ;;  %v543_v7 = vld [vmem:[#allocation5 + $0x30] sm:$0xff]   ;;  %v544_v8 = vld [vmem:[#allocation5 + $0x38] sm:$0xff]   ;;  %s194_s19 = scalar_lea.vmem [#allocation7], %s418_s17  ;;  %s884_s7 = scalar_lea.hbm %s933_s2, %s428_s4 }
  0x5d   : > { %442 = vmatprep.subr.bf16.mxu0 %v695_v0  ;;  %v196_v9 = vld [vmem:[%s866_s16] sm:$0xf]  ;;  %s317_s21 = sshll.u32 %s194_s19, 4  ;;  %s303_s24 = scalar_lea.sflag [#allocation4], %s862_s18  ;;  %s879_s21 = int_to_ptr.vmem [resolvable:$true] %s317_s21 }
  0x5e   : > { %s603_s22 = scalar_lea.vmem %s879_s21, 128  ;;  %s697_s12 = smov [#allocation7]  }
  0x5f   : > { %p604_p4 = scmp.ne.s32.totalorder %s879_s21, %s603_s22  ;;  %s607_s27 = sshll.u32 %s697_s12, 4  ;;  %s608_s27 = int_to_ptr.vmem [resolvable:$false] %s607_s27 }
  0x60   : > { %443 = vmatpush3.bf16.msra.mxu0 %v538_v2  ;;  %s609_s23 = scalar_lea.vmem %s608_s27, 256  ;;  %p610_p12 = scmp.lt.s32.totalorder %s879_s21, %s608_s27 }
  0x61   : > { %444 = vmatprep.subr.bf16.mxu0 %v695_v0  ;;  %p605_p6 = pnand %p604_p4, %p809_p10  ;;  %p611_p11 = scmp.lt.s32.totalorder %s609_s23, %s603_s22 }
  0x63   : > { %p606_p8 = pneg %p605_p6  ;;  %p612_p0 = por %p611_p11, %p610_p12 }
  0x64   : > { %445 = vmatpush3.bf16.msra.mxu0 %v539_v3 }
  0x65   : > { %446 = vmatprep.subr.bf16.mxu0 %v695_v0  ;;  %p613_p5 = pnand %p612_p0, %p606_p8 }
  0x68   : > { %447 = vmatpush3.bf16.msra.mxu0 %v540_v4 }
  0x69   : > { %448 = vmatprep.subr.bf16.mxu0 %v695_v0 }
  0x6c   : > { %449 = vmatpush3.bf16.msra.mxu0 %v541_v5 }
  0x6d   : > { %450 = vmatprep.subr.bf16.mxu0 %v695_v0 }
  0x70   : > { %451 = vmatpush3.bf16.msra.mxu0 %v542_v6 }
  0x71   : > { %452 = vmatprep.subr.bf16.mxu0 %v695_v0 }
  0x74   : > { %453 = vmatpush3.bf16.msra.mxu0 %v543_v7 }
  0x75   : > { %454 = vmatprep.subr.bf16.mxu0 %v695_v0 }
  0x78   : > { %455 = vmatpush3.bf16.msra.mxu0 %v544_v8 }
  0x7b   : > { %457 = vmatmul.mubr.bf16.vlgmr.msra.gmra.mrb[0].mxu0 %v196_v9 }
 0x14e   : > { %v295_v10 = vpop.f32.mrb[0].mxu0 }
 0x14f   : > { %301 = vst [vmem:[%s194_s19] sm:$0xff] %v295_v10  ;;  %v458_v11 = vpop.f32.mrb[1].mxu0 }
 0x150   : > { %v298_v12 = vpop.f32.mrb[2].mxu0 }
 0x151   : > { %616 = shalt.err (!%p613_p5)
}
 0x152   : > { %s617_s29 = scalar_lea.hbm %s884_s7, 128  ;;  %s621_s18 = scalar_lea.hbm %s933_s2, 256 }
 0x153   : > { %p618_p9 = scmp.ne.s32.totalorder %s884_s7, %s617_s29  ;;  %p622_p7 = scmp.lt.u32.totalorder %s884_s7, %s933_s2 }
 0x154   : > { %p623_p3 = scmp.lt.u32.totalorder %s621_s18, %s617_s29  ;;  %p625_p4 = scmp.lt.u32.totalorder %s617_s29, %s884_s7 }
 0x155   : > { %p619_p1 = pnand %p618_p9, %p809_p10 }
 0x156   : > { %p624_p13 = por %p623_p3, %p622_p7 }
 0x157   : > { %p620_p2 = pneg %p619_p1 }
 0x158   : > { %p626_p6 = por %p625_p4, %p624_p13 }
 0x15a   : > { %p627_p8 = pnand %p626_p6, %p620_p2 }
 0x15c   : > { %630 = shalt.err (!%p627_p8)
}
 0x15d   : > { %466 = dma.vmem_to_hbm [thread:$0]  (%p809_p10), %s879_s21, 128, %s884_s7, %s303_s24   ;;  %v459_v13 = vpop.f32.mrb[3].mxu0 }
 0x15e PF: > { %s329_s16 = sand.u32 1, %s669_s9   ;;  %p951_p12 = scmp.ne.s32.totalorder %s941_s20, 0 }
 0x15f   : > { %p952_p11 = scmp.ge.s32.totalorder %s689_s14, 2  ;;  %s330_s17 = scalar_lea.sflag [#allocation4], %s329_s16 }
 0x161   : > { %p477_p0 = pnand %p952_p11, %p951_p12 }
 0x163   : > { %664 = dma.done.wait (!%p477_p0), %s330_s17, 128  }
 0x164   : > { %666 = vsyncadd (!%p477_p0), %s330_s17, 4294967168  ;;  %s19_s14 = sadd.s32 1, %s689_s14   ;;  %s953_s9 = smov %s673_s10 }
 0x165   : > { %p16_p5 = scmp.ge.s32.totalorder %s19_s14, 4   ;;  %s954_s10 = smov %s677_s11 }
 0x166   : > { %s955_s11 = smov %s818_s28  ;;  %s956_s12 = smov %s685_s13 }
 0x167   : > { %s957_s13 = smov %s959_s25  ;;  %18 = sbr.rel (!%p16_p5) target bundleno = 7 (0x7), region = 78 }
 0x16e   :  { %335 = vsyncpa [#allocation3], 1 }
 0x16f   :  { %337 = vsyncpa [#allocation3 + $0x1], 1 }
 0x170   :  { %338 = vsyncpa [#allocation6], 1 }
 0x171   :  { %339 = vsyncpa [#allocation4], 1 }
 0x172   :  { %341 = vsyncpa [#allocation4 + $0x1], 1 }

// kernel: transformer_lm_forward.3
= control target key start
LH: loop header
LB: loop body
LE: loop exit
PB: predicated region body
PF: predicated region fallthrough
CT: control target
= control target key end

     0   :  { %s3884_s0 = inlined_call_operand.hbm [shape: bf16[2,8,128], index: 0, kind: input, shape index: {}]   ;;  %s3885_s1 = inlined_call_operand.hbm [shape: f32[1,128], index: 1, kind: input, shape index: {}]   ;;  %s3886_s2 = inlined_call_operand.hbm [shape: f32[1,128], index: 2, kind: input, shape index: {}]   ;;  %s3887_s3 = inlined_call_operand.hbm [shape: bf16[128,384], index: 3, kind: input, shape index: {}]   ;;  %s3888_s4 = inlined_call_operand.hbm [shape: f32[1,384], index: 4, kind: input, shape index: {}]   ;;  %s3889_s5 = inlined_call_operand.hbm [shape: bf16[128,128], index: 5, kind: input, shape index: {}]   ;;  %s3890_s6 = inlined_call_operand.hbm [shape: f32[1,128], index: 6, kind: input, shape index: {}]   ;;  %s3891_s7 = inlined_call_operand.hbm [shape: f32[1,128], index: 7, kind: input, shape index: {}]   ;;  %s3892_s8 = inlined_call_operand.hbm [shape: f32[1,128], index: 8, kind: input, shape index: {}]   ;;  %s3893_s9 = inlined_call_operand.hbm [shape: bf16[128,256], index: 9, kind: input, shape index: {}]   ;;  %s3894_s10 = inlined_call_operand.hbm [shape: f32[1,256], index: 10, kind: input, shape index: {}]   ;;  %s3895_s11 = inlined_call_operand.hbm [shape: bf16[256,128], index: 11, kind: input, shape index: {}]   ;;  %s3896_s12 = inlined_call_operand.hbm [shape: f32[1,128], index: 12, kind: input, shape index: {}]   ;;  %s3897_s13 = inlined_call_operand.hbm [shape: bf16[2,8,128], index: 13, kind: output, shape index: {}]  }
   0x1   :  { %3909 = sst [smem:[#allocation35_spill]] %s3884_s0 }
   0x2   :  { %3910 = sst [smem:[#allocation36_spill]] %s3885_s1 }
   0x3   :  { %3911 = sst [smem:[#allocation37_spill]] %s3887_s3 }
   0x4   :  { %3912 = sst [smem:[#allocation38_spill]] %s3897_s13 }
   0x5   :  { %18 = vsyncpa [#allocation3], 0 }
   0x6   :  { %20 = vsyncpa [#allocation3 + $0x1], 0 }
   0x7   :  { %21 = vsyncpa [#allocation6], 0 }
   0x8   :  { %22 = vsyncpa [#allocation9], 0 }
   0x9   :  { %23 = vsyncpa [#allocation12], 0 }
   0xa   :  { %24 = vsyncpa [#allocation15], 0 }
   0xb   :  { %25 = vsyncpa [#allocation18], 0 }
   0xc   :  { %26 = vsyncpa [#allocation21], 0 }
   0xd   :  { %27 = vsyncpa [#allocation4], 0 }
   0xe   :  { %29 = vsyncpa [#allocation4 + $0x1], 0  ;;  %s3292_s25 = smov 0   ;;  %s3294_s26 = smov 0  }
   0xf   :  { %s3296_s27 = smov 0   ;;  %s3298_s28 = smov 0  }
  0x10 LB: > { %3913 = sst [smem:[#allocation32_spill]] %s3182_s25  ;;  %s3196_s29 = smov [#allocation5]   ;;  %s3194_s28 = sphi %s3298_s28, %s3955_s28   ;;  %s3190_s27 = sphi %s3296_s27, %s3954_s27   ;;  %s3186_s26 = sphi %s3294_s26, %s3953_s26   ;;  %s3182_s25 = sphi %s3292_s25, %s3952_s25  }
  0x11   : > { %s357_s30 = sshll.u32 %s3196_s29, 4  ;;  %s3313_s14 = sadd.s32 4294967295, %s3194_s28   ;;  %s3318_s30 = int_to_ptr.vmem [resolvable:$true] %s357_s30 }
  0x12   : > { %3914 = sst [smem:[#allocation33_spill]] %s3313_s14  ;;  %p2170_p0 = scmp.ge.s32.totalorder %s3194_s28, 1 }
  0x13   : > { %p3904_p1 = scmp.eq.s32.totalorder %s3313_s14, 0  ;;  %p344_p2 = scmp.lt.s32.totalorder %s3194_s28, 3 }
  0x14   : > { %s3197_s16 = smov [#allocation8]   ;;  %s3198_s19 = smov [#allocation11]  }
  0x15   : > { %p3320_p3 = pnand %p2170_p0, %p344_p2  ;;  %s378_s17 = sshll.u32 %s3197_s16, 4  ;;  %s3327_s17 = int_to_ptr.vmem [resolvable:$true] %s378_s17 }
  0x16   : > { %s402_s20 = sshll.u32 %s3198_s19, 4  ;;  %s3918_s1 = sld [smem:[#allocation36_spill]]  ;;  %s3335_s20 = int_to_ptr.vmem [resolvable:$true] %s402_s20 }
  0x17   : > { %s3915_s15 = scalar_select %p3320_p3, 1, 0 }
  0x18   : > { %p2511_p5 = pneg %p3320_p3 }
  0x19   : > { %3916 = sst [smem:[#allocation34_spill]] %s3915_s15 }
  0x1a   : > { %p3331_p6 = pnand %p2511_p5, %p3904_p1 }
  0x1c   : > { %s2738_s23 = scalar_lea.hbm %s3918_s1, 16  ;;  %p3345_p8 = pneg %p3331_p6 }
  0x1d   : > { %p2739_p7 = scmp.ne.s32.totalorder %s3918_s1, %s2738_s23  ;;  %p2745_p11 = scmp.lt.u32.totalorder %s2738_s23, %s3918_s1 }
  0x1f   : > { %p2741_p9 = pnand %p3345_p8, %p2739_p7 }
  0x21   : > { %p2742_p10 = pneg %p2741_p9 }
  0x23   : > { %p2747_p12 = pnand %p2745_p11, %p2742_p10 }
  0x25   : > { %2750 = shalt.err (!%p2747_p12)
}
  0x26   : > { %s2751_s21 = scalar_lea.vmem %s3318_s30, 16  ;;  %s2758_s22 = scalar_lea.vmem %s3318_s30, 32 }
  0x27   : > { %p2752_p13 = scmp.ne.s32.totalorder %s3318_s30, %s2751_s21  ;;  %p2759_p5 = scmp.lt.s32.totalorder %s3318_s30, %s3318_s30 }
  0x28   : > { %p2760_p7 = scmp.lt.s32.totalorder %s2758_s22, %s2751_s21 }
  0x29   : > { %p2754_p0 = pnand %p2752_p13, %p3345_p8 }
  0x2a   : > { %p2761_p9 = por %p2760_p7, %p2759_p5 }
  0x2b   : > { %p2755_p2 = pneg %p2754_p0 }
  0x2d   : > { %p2762_p4 = pnand %p2761_p9, %p2755_p2 }
  0x2f   : > { %2765 = shalt.err (!%p2762_p4)
}
  0x30   : > { %2514 = dma.hbm_to_vmem [thread:$0]  (!%p3331_p6), %s3918_s1, 16, %s3318_s30, [#allocation6]  }
  0x31   : > { %s3920_s3 = sld [smem:[#allocation37_spill]] }
  0x37   : > { %s2766_s19 = scalar_lea.hbm %s3920_s3, 3072 }
  0x38   : > { %p2767_p10 = scmp.ne.s32.totalorder %s3920_s3, %s2766_s19  ;;  %p2773_p4 = scmp.lt.u32.totalorder %s2766_s19, %s3920_s3 }
  0x3a   : > { %p2769_p11 = pnand %p2767_p10, %p3345_p8 }
  0x3c   : > { %p2770_p12 = pneg %p2769_p11 }
  0x3e   : > { %p2775_p13 = pnand %p2773_p4, %p2770_p12 }
  0x40   : > { %2778 = shalt.err (!%p2775_p13)
}
  0x41   : > { %s2779_s30 = scalar_lea.vmem %s3327_s17, 3072  ;;  %p2787_p7 = scmp.lt.s32.totalorder %s3327_s17, %s3327_s17 }
  0x42   : > { %p2780_p0 = scmp.ne.s32.totalorder %s3327_s17, %s2779_s30  ;;  %p2788_p9 = scmp.lt.s32.totalorder %s2779_s30, %s2779_s30 }
  0x44   : > { %p2782_p2 = pnand %p2780_p0, %p3345_p8  ;;  %p2789_p10 = por %p2788_p9, %p2787_p7 }
  0x46   : > { %p2783_p5 = pneg %p2782_p2 }
  0x48   : > { %p2790_p11 = pnand %p2789_p10, %p2783_p5 }
  0x4a   : > { %2793 = shalt.err (!%p2790_p11)
}
  0x4b   : > { %s3199_s0 = smov 192   ;;  %s3200_s15 = smov 12  }
  0x4c   : > { %2520 = dma.hbm_to_vmem [thread:$0]  (!%p3331_p6), %s3920_s3, 3072, %s3327_s17, [#allocation9], %s3199_s0, %s3199_s0, %s3200_s15  }
  0x4d   : > { %s2794_s19 = scalar_lea.hbm %s3889_s5, 1024 }
  0x4e   : > { %p2795_p12 = scmp.ne.s32.totalorder %s3889_s5, %s2794_s19  ;;  %p2801_p0 = scmp.lt.u32.totalorder %s2794_s19, %s3889_s5 }
  0x50   : > { %p2797_p4 = pnand %p2795_p12, %p3345_p8 }
  0x52   : > { %p2798_p13 = pneg %p2797_p4 }
  0x54   : > { %p2803_p2 = pnand %p2801_p0, %p2798_p13 }
  0x56   : > { %2806 = shalt.err (!%p2803_p2)
}
  0x57   : > { %s2807_s17 = scalar_lea.vmem %s3335_s20, 1024  ;;  %p2815_p10 = scmp.lt.s32.totalorder %s3335_s20, %s3335_s20 }
  0x58   : > { %p2808_p5 = scmp.ne.s32.totalorder %s3335_s20, %s2807_s17  ;;  %p2816_p11 = scmp.lt.s32.totalorder %s2807_s17, %s2807_s17 }
  0x5a   : > { %p2810_p7 = pnand %p2808_p5, %p3345_p8  ;;  %p2817_p12 = por %p2816_p11, %p2815_p10 }
  0x5c   : > { %p2811_p9 = pneg %p2810_p7 }
  0x5e   : > { %p2818_p4 = pnand %p2817_p12, %p2811_p9 }
  0x60   : > { %2821 = shalt.err (!%p2818_p4)
}
  0x61   : > { %s3906_s0 = smov 64   ;;  %s3907_s1 = smov 4  }
  0x62   : > { %2526 = dma.hbm_to_vmem [thread:$0]  (!%p3331_p6), %s3889_s5, 1024, %s3335_s20, [#allocation12], %s3906_s0, %s3906_s0, %s3907_s1  }
  0x63   : > { %s3203_s23 = smov [#allocation14]   ;;  %s3204_s29 = smov [#allocation17]  }
  0x64   : > { %s427_s24 = sshll.u32 %s3203_s23, 4  ;;  %s448_s19 = sshll.u32 %s3204_s29, 4  ;;  %s428_s24 = int_to_ptr.vmem [resolvable:$true] %s427_s24  ;;  %s449_s19 = int_to_ptr.vmem [resolvable:$true] %s448_s19 }
  0x65   : > { %s2822_s30 = scalar_lea.hbm %s3891_s7, 16 }
  0x66   : > { %p2823_p13 = scmp.ne.s32.totalorder %s3891_s7, %s2822_s30  ;;  %p2829_p5 = scmp.lt.u32.totalorder %s2822_s30, %s3891_s7 }
  0x68   : > { %p2825_p0 = pnand %p2823_p13, %p3345_p8 }
  0x6a   : > { %p2826_p2 = pneg %p2825_p0 }
  0x6c   : > { %p2831_p7 = pnand %p2829_p5, %p2826_p2 }
  0x6e   : > { %2834 = shalt.err (!%p2831_p7)
}
  0x6f   : > { %s2835_s20 = scalar_lea.vmem %s428_s24, 16  ;;  %s2842_s15 = scalar_lea.vmem %s428_s24, 32 }
  0x70   : > { %p2836_p9 = scmp.ne.s32.totalorder %s428_s24, %s2835_s20  ;;  %p2843_p12 = scmp.lt.s32.totalorder %s428_s24, %s428_s24 }
  0x71   : > { %p2844_p4 = scmp.lt.s32.totalorder %s2842_s15, %s2835_s20 }
  0x72   : > { %p2838_p10 = pnand %p2836_p9, %p3345_p8 }
  0x73   : > { %p2845_p1 = por %p2844_p4, %p2843_p12 }
  0x74   : > { %p2839_p11 = pneg %p2838_p10 }
  0x76   : > { %p2846_p3 = pnand %p2845_p1, %p2839_p11 }
  0x78   : > { %2849 = shalt.err (!%p2846_p3)
}
  0x79   : > { %2532 = dma.hbm_to_vmem [thread:$0]  (!%p3331_p6), %s3891_s7, 16, %s428_s24, [#allocation15]  }
  0x7a   : > { %s2850_s23 = scalar_lea.hbm %s3893_s9, 2048 }
  0x7b   : > { %p2851_p13 = scmp.ne.s32.totalorder %s3893_s9, %s2850_s23  ;;  %p2857_p3 = scmp.lt.u32.totalorder %s2850_s23, %s3893_s9 }
  0x7d   : > { %p2853_p0 = pnand %p2851_p13, %p3345_p8 }
  0x7f   : > { %p2854_p1 = pneg %p2853_p0 }
  0x81   : > { %p2859_p2 = pnand %p2857_p3, %p2854_p1 }
  0x83   : > { %2862 = shalt.err (!%p2859_p2)
}
  0x84   : > { %s2863_s17 = scalar_lea.vmem %s449_s19, 2048  ;;  %p2871_p10 = scmp.lt.s32.totalorder %s449_s19, %s449_s19 }
  0x85   : > { %p2864_p5 = scmp.ne.s32.totalorder %s449_s19, %s2863_s17  ;;  %p2872_p11 = scmp.lt.s32.totalorder %s2863_s17, %s2863_s17 }
  0x87   : > { %p2866_p7 = pnand %p2864_p5, %p3345_p8  ;;  %p2873_p12 = por %p2872_p11, %p2871_p10 }
  0x89   : > { %p2867_p9 = pneg %p2866_p7 }
  0x8b   : > { %p2874_p4 = pnand %p2873_p12, %p2867_p9 }
  0x8d   : > { %2877 = shalt.err (!%p2874_p4)
}
  0x8e   : > { %s3205_s24 = smov 128   ;;  %s3206_s20 = smov 8  }
  0x8f   : > { %2538 = dma.hbm_to_vmem [thread:$0]  (!%p3331_p6), %s3893_s9, 2048, %s449_s19, [#allocation18], %s3205_s24, %s3205_s24, %s3206_s20  }
  0x90   : > { %s3207_s13 = smov [#allocation20]   ;;  %s3208_s14 = smov [#allocation7]  }
  0x91   : > { %s472_s25 = sshll.u32 %s3207_s13, 4  ;;  %s368_s23 = sshll.u32 %s3208_s14, 4  ;;  %s473_s25 = int_to_ptr.vmem [resolvable:$true] %s472_s25  ;;  %s369_s23 = int_to_ptr.vmem [resolvable:$true] %s368_s23 }
  0x92   : > { %s2878_s22 = scalar_lea.hbm %s3895_s11, 2048 }
  0x93   : > { %p2879_p13 = scmp.ne.s32.totalorder %s3895_s11, %s2878_s22  ;;  %p2885_p3 = scmp.lt.u32.totalorder %s2878_s22, %s3895_s11 }
  0x95   : > { %p2881_p0 = pnand %p2879_p13, %p3345_p8 }
  0x97   : > { %p2882_p1 = pneg %p2881_p0 }
  0x99   : > { %p2887_p2 = pnand %p2885_p3, %p2882_p1 }
  0x9b   : > { %2890 = shalt.err (!%p2887_p2)
}
  0x9c   : > { %s2891_s19 = scalar_lea.vmem %s473_s25, 2048  ;;  %p2899_p10 = scmp.lt.s32.totalorder %s473_s25, %s473_s25 }
  0x9d   : > { %p2892_p5 = scmp.ne.s32.totalorder %s473_s25, %s2891_s19  ;;  %p2900_p11 = scmp.lt.s32.totalorder %s2891_s19, %s2891_s19 }
  0x9f   : > { %p2894_p7 = pnand %p2892_p5, %p3345_p8  ;;  %p2901_p12 = por %p2900_p11, %p2899_p10 }
  0xa1   : > { %p2895_p9 = pneg %p2894_p7 }
  0xa3   : > { %p2902_p4 = pnand %p2901_p12, %p2895_p9 }
  0xa5   : > { %2905 = shalt.err (!%p2902_p4)
}
  0xa6   : > { %s3921_s24 = smov 4   ;;  %s3922_s20 = smov 64  }
  0xa7   : > { %2544 = dma.hbm_to_vmem [thread:$0]  (!%p3331_p6), %s3895_s11, 2048, %s473_s25, [#allocation21], %s3922_s20, %s3922_s20, %s3921_s24  }
  0xa8   : > { %s2906_s13 = scalar_lea.hbm %s3886_s2, 16 }
  0xa9   : > { %p2907_p13 = scmp.ne.s32.totalorder %s3886_s2, %s2906_s13  ;;  %p2913_p3 = scmp.lt.u32.totalorder %s2906_s13, %s3886_s2 }
  0xab   : > { %p2909_p0 = pnand %p2907_p13, %p3345_p8 }
  0xad   : > { %p2910_p1 = pneg %p2909_p0 }
  0xaf   : > { %p2915_p2 = pnand %p2913_p3, %p2910_p1 }
  0xb1   : > { %2918 = shalt.err (!%p2915_p2)
}
  0xb2   : > { %s2919_s30 = scalar_lea.vmem %s369_s23, 16  ;;  %s2926_s25 = scalar_lea.vmem %s369_s23, 32 }
  0xb3   : > { %p2920_p5 = scmp.ne.s32.totalorder %s369_s23, %s2919_s30  ;;  %p2927_p10 = scmp.lt.s32.totalorder %s369_s23, %s369_s23 }
  0xb4   : > { %p2928_p11 = scmp.lt.s32.totalorder %s2926_s25, %s2919_s30 }
  0xb5   : > { %p2922_p7 = pnand %p2920_p5, %p3345_p8 }
  0xb6   : > { %p2929_p12 = por %p2928_p11, %p2927_p10 }
  0xb7   : > { %p2923_p9 = pneg %p2922_p7 }
  0xb9   : > { %p2930_p4 = pnand %p2929_p12, %p2923_p9 }
  0xbb   : > { %2933 = shalt.err (!%p2930_p4)
}
  0xbc   : > { %2517 = dma.hbm_to_vmem [thread:$0]  (!%p3331_p6), %s3886_s2, 16, %s369_s23, [#allocation6]  }
  0xbd   : > { %s3209_s24 = smov [#allocation10]   ;;  %s3210_s0 = smov [#allocation13]  }
  0xbe   : > { %s392_s20 = sshll.u32 %s3209_s24, 4  ;;  %s416_s1 = sshll.u32 %s3210_s0, 4  ;;  %s393_s20 = int_to_ptr.vmem [resolvable:$true] %s392_s20  ;;  %s417_s1 = int_to_ptr.vmem [resolvable:$true] %s416_s1 }
  0xbf   : > { %s2934_s13 = scalar_lea.hbm %s3888_s4, 48 }
  0xc0   : > { %p2935_p13 = scmp.ne.s32.totalorder %s3888_s4, %s2934_s13  ;;  %p2941_p3 = scmp.lt.u32.totalorder %s2934_s13, %s3888_s4 }
  0xc2   : > { %p2937_p0 = pnand %p2935_p13, %p3345_p8 }
  0xc4   : > { %p2938_p1 = pneg %p2937_p0 }
  0xc6   : > { %p2943_p2 = pnand %p2941_p3, %p2938_p1 }
  0xc8   : > { %2946 = shalt.err (!%p2943_p2)
}
  0xc9   : > { %s2947_s23 = scalar_lea.vmem %s393_s20, 48  ;;  %s2954_s30 = scalar_lea.vmem %s393_s20, 64 }
  0xca   : > { %p2948_p5 = scmp.ne.s32.totalorder %s393_s20, %s2947_s23  ;;  %p2955_p10 = scmp.lt.s32.totalorder %s393_s20, %s393_s20 }
  0xcb   : > { %p2956_p11 = scmp.lt.s32.totalorder %s2954_s30, %s2947_s23 }
  0xcc   : > { %p2950_p7 = pnand %p2948_p5, %p3345_p8 }
  0xcd   : > { %p2957_p12 = por %p2956_p11, %p2955_p10 }
  0xce   : > { %p2951_p9 = pneg %p2950_p7 }
  0xd0   : > { %p2958_p4 = pnand %p2957_p12, %p2951_p9 }
  0xd2   : > { %2961 = shalt.err (!%p2958_p4)
}
  0xd3   : > { %2523 = dma.hbm_to_vmem [thread:$0]  (!%p3331_p6), %s3888_s4, 48, %s393_s20, [#allocation9]  }
  0xd4   : > { %s2962_s0 = scalar_lea.hbm %s3890_s6, 16 }
  0xd5   : > { %p2963_p13 = scmp.ne.s32.totalorder %s3890_s6, %s2962_s0  ;;  %p2969_p3 = scmp.lt.u32.totalorder %s2962_s0, %s3890_s6 }
  0xd7   : > { %p2965_p0 = pnand %p2963_p13, %p3345_p8 }
  0xd9   : > { %p2966_p1 = pneg %p2965_p0 }
  0xdb   : > { %p2971_p2 = pnand %p2969_p3, %p2966_p1 }
  0xdd   : > { %2974 = shalt.err (!%p2971_p2)
}
  0xde   : > { %s2975_s29 = scalar_lea.vmem %s417_s1, 16  ;;  %s2982_s20 = scalar_lea.vmem %s417_s1, 32 }
  0xdf   : > { %p2976_p5 = scmp.ne.s32.totalorder %s417_s1, %s2975_s29  ;;  %p2983_p10 = scmp.lt.s32.totalorder %s417_s1, %s417_s1 }
  0xe0   : > { %p2984_p11 = scmp.lt.s32.totalorder %s2982_s20, %s2975_s29 }
  0xe1   : > { %p2978_p7 = pnand %p2976_p5, %p3345_p8 }
  0xe2   : > { %p2985_p12 = por %p2984_p11, %p2983_p10 }
  0xe3   : > { %p2979_p9 = pneg %p2978_p7 }
  0xe5   : > { %p2986_p4 = pnand %p2985_p12, %p2979_p9 }
  0xe7   : > { %2989 = shalt.err (!%p2986_p4)
}
  0xe8   : > { %2529 = dma.hbm_to_vmem [thread:$0]  (!%p3331_p6), %s3890_s6, 16, %s417_s1, [#allocation12]  }
  0xe9   : > { %s3211_s23 = smov [#allocation16]   ;;  %s3212_s25 = smov [#allocation19]  }
  0xea   : > { %s438_s30 = sshll.u32 %s3211_s23, 4  ;;  %s462_s17 = sshll.u32 %s3212_s25, 4  ;;  %s439_s30 = int_to_ptr.vmem [resolvable:$true] %s438_s30  ;;  %s463_s17 = int_to_ptr.vmem [resolvable:$true] %s462_s17 }
  0xeb   : > { %s2990_s0 = scalar_lea.hbm %s3892_s8, 16 }
  0xec   : > { %p2991_p13 = scmp.ne.s32.totalorder %s3892_s8, %s2990_s0  ;;  %p2997_p3 = scmp.lt.u32.totalorder %s2990_s0, %s3892_s8 }
  0xee   : > { %p2993_p0 = pnand %p2991_p13, %p3345_p8 }
  0xf0   : > { %p2994_p1 = pneg %p2993_p0 }
  0xf2   : > { %p2999_p2 = pnand %p2997_p3, %p2994_p1 }
  0xf4   : > { %3002 = shalt.err (!%p2999_p2)
}
  0xf5   : > { %s3003_s1 = scalar_lea.vmem %s439_s30, 16  ;;  %s3010_s29 = scalar_lea.vmem %s439_s30, 32 }
  0xf6   : > { %p3004_p5 = scmp.ne.s32.totalorder %s439_s30, %s3003_s1  ;;  %p3011_p10 = scmp.lt.s32.totalorder %s439_s30, %s439_s30 }
  0xf7   : > { %p3012_p11 = scmp.lt.s32.totalorder %s3010_s29, %s3003_s1 }
  0xf8   : > { %p3006_p7 = pnand %p3004_p5, %p3345_p8 }
  0xf9   : > { %p3013_p12 = por %p3012_p11, %p3011_p10 }
  0xfa   : > { %p3007_p9 = pneg %p3006_p7 }
  0xfc   : > { %p3014_p4 = pnand %p3013_p12, %p3007_p9 }
  0xfe   : > { %3017 = shalt.err (!%p3014_p4)
}
  0xff   : > { %2535 = dma.hbm_to_vmem [thread:$0]  (!%p3331_p6), %s3892_s8, 16, %s439_s30, [#allocation15]  }
 0x100   : > { %s3018_s25 = scalar_lea.hbm %s3894_s10, 32 }
 0x101   : > { %p3019_p13 = scmp.ne.s32.totalorder %s3894_s10, %s3018_s25  ;;  %p3025_p3 = scmp.lt.u32.totalorder %s3018_s25, %s3894_s10 }
 0x103   : > { %p3021_p0 = pnand %p3019_p13, %p3345_p8 }
 0x105   : > { %p3022_p1 = pneg %p3021_p0 }
 0x107   : > { %p3027_p2 = pnand %p3025_p3, %p3022_p1 }
 0x109   : > { %3030 = shalt.err (!%p3027_p2)
}
 0x10a   : > { %s3031_s3 = scalar_lea.vmem %s463_s17, 32  ;;  %p3039_p10 = scmp.lt.s32.totalorder %s463_s17, %s463_s17 }
 0x10b   : > { %p3032_p5 = scmp.ne.s32.totalorder %s463_s17, %s3031_s3  ;;  %p3040_p11 = scmp.lt.s32.totalorder %s3031_s3, %s3031_s3 }
 0x10d   : > { %p3034_p7 = pnand %p3032_p5, %p3345_p8  ;;  %p3041_p12 = por %p3040_p11, %p3039_p10 }
 0x10f   : > { %p3035_p9 = pneg %p3034_p7 }
 0x111   : > { %p3042_p4 = pnand %p3041_p12, %p3035_p9 }
 0x113   : > { %3045 = shalt.err (!%p3042_p4)
}
 0x114   : > { %2541 = dma.hbm_to_vmem [thread:$0]  (!%p3331_p6), %s3894_s10, 32, %s463_s17, [#allocation18]  }
 0x115   : > { %s3213_s14 = smov [#allocation22]   ;;  %s3046_s21 = scalar_lea.hbm %s3896_s12, 16 }
 0x116   : > { %s486_s1 = sshll.u32 %s3213_s14, 4  ;;  %p3047_p13 = scmp.ne.s32.totalorder %s3896_s12, %s3046_s21  ;;  %s487_s1 = int_to_ptr.vmem [resolvable:$true] %s486_s1 }
 0x117   : > { %p3053_p3 = scmp.lt.u32.totalorder %s3046_s21, %s3896_s12 }
 0x118   : > { %p3049_p0 = pnand %p3047_p13, %p3345_p8 }
 0x11a   : > { %p3050_p1 = pneg %p3049_p0 }
 0x11c   : > { %p3055_p2 = pnand %p3053_p3, %p3050_p1 }
 0x11e   : > { %3058 = shalt.err (!%p3055_p2)
}
 0x11f   : > { %s3059_s17 = scalar_lea.vmem %s487_s1, 16  ;;  %s3066_s24 = scalar_lea.vmem %s487_s1, 32 }
 0x120   : > { %p3060_p5 = scmp.ne.s32.totalorder %s487_s1, %s3059_s17  ;;  %p3067_p10 = scmp.lt.s32.totalorder %s487_s1, %s487_s1 }
 0x121   : > { %p3068_p11 = scmp.lt.s32.totalorder %s3066_s24, %s3059_s17 }
 0x122   : > { %p3062_p7 = pnand %p3060_p5, %p3345_p8 }
 0x123   : > { %p3069_p12 = por %p3068_p11, %p3067_p10 }
 0x124   : > { %p3063_p9 = pneg %p3062_p7 }
 0x126   : > { %p3070_p4 = pnand %p3069_p12, %p3063_p9 }
 0x128   : > { %3073 = shalt.err (!%p3070_p4)
}
 0x129   : > { %s3923_s16 = sld [smem:[#allocation32_spill]]  ;;  %s3924_s3 = sld [smem:[#allocation33_spill]] }
 0x12a   : > { %2547 = dma.hbm_to_vmem [thread:$0]  (!%p3331_p6), %s3896_s12, 16, %s487_s1, [#allocation21]  }
 0x12b   : > { %s2169_s30 = sadd.s32 4294967294, %s3194_s28   ;;  %s3583_s18 = sadd.s32 1, %s3194_s28  }
 0x12c   : > { %s39_s13 = ssub.s32 %s3194_s28, %s3583_s18  ;;  %s42_s14 = sadd.s32 1, %s3190_s27 }
 0x12d   : > { %p40_p8 = scmp.eq.s32.totalorder %s39_s13, 0  ;;  %p49_p13 = scmp.ne.s32.totalorder %s3190_s27, %s3186_s26 }
 0x12e   : > { %p50_p0 = scmp.eq.s32.totalorder %s3194_s28, 0  ;;  %p337_p7 = scmp.eq.s32.totalorder %s2169_s30, 1 }
 0x12f   : > { %p55_p1 = scmp.ne.s32.totalorder %s3186_s26, %s3923_s16  ;;  %p3926_p2 = scmp.eq.s32.totalorder %s3924_s3, 0 }
 0x130   : > { %s3594_s29 = scalar_select %p40_p8, %s3190_s27, %s42_s14  }
 0x131   : > { %p3596_p3 = por %p50_p0, %p49_p13  ;;  %p3602_p6 = por %p3926_p2, %p55_p1 }
 0x132   : > { %p331_p5 = scmp.eq.s32.totalorder %s3924_s3, 1  ;;  %p2568_p9 = scmp.lt.s32.totalorder %s3194_s28, 2 }
 0x133   : > { %s497_s21 = sand.u32 1, %s3190_s27   ;;  %p3613_p11 = por %p337_p7, %p55_p1 }
 0x134   : > { %p3609_p10 = por %p331_p5, %p49_p13  ;;  %s2184_s25 = sshll.u32 %s497_s21, 2 }
 0x135   : > { %s3929_s23 = scalar_select %p3613_p11, 1, 0 }
 0x136   : > { %s3928_s22 = scalar_select %p3609_p10, 1, 0 }
 0x137   : > { %s2185_s19 = sshll.u32 %s3194_s28, 6  ;;  %s3930_s0 = sld [smem:[#allocation35_spill]] }
 0x138   : > { %s501_s16 = scalar_lea.vmem [#allocation2], %s2184_s25  ;;  %p3627_p12 = pnand %p2568_p9, %p3596_p3 }
 0x139   : > { %s508_s3 = sshll.u32 %s501_s16, 4  ;;  %s498_s13 = scalar_lea.sflag [#allocation3], %s497_s21  ;;  %s3623_s3 = int_to_ptr.vmem [resolvable:$true] %s508_s3 }
 0x13a   : > { %p3076_p8 = pneg %p3627_p12 }
 0x13d   : > { %s3621_s15 = scalar_lea.hbm %s3930_s0, %s2185_s19  ;;  %s3079_s17 = scalar_lea.hbm %s3930_s0, 128 }
 0x13e   : > { %s3074_s14 = scalar_lea.hbm %s3621_s15, 64  ;;  %p3080_p1 = scmp.lt.u32.totalorder %s3621_s15, %s3930_s0 }
 0x13f   : > { %p3075_p4 = scmp.ne.s32.totalorder %s3621_s15, %s3074_s14  ;;  %p3081_p3 = scmp.lt.u32.totalorder %s3079_s17, %s3074_s14 }
 0x140   : > { %p3083_p5 = scmp.lt.u32.totalorder %s3074_s14, %s3621_s15 }
 0x141   : > { %p3077_p13 = pnand %p3076_p8, %p3075_p4  ;;  %p3082_p2 = por %p3081_p3, %p3080_p1 }
 0x143   : > { %p3078_p0 = pneg %p3077_p13  ;;  %p3084_p7 = por %p3083_p5, %p3082_p2 }
 0x145   : > { %p3085_p9 = pnand %p3084_p7, %p3078_p0 }
 0x147   : > { %3088 = shalt.err (!%p3085_p9)
}
 0x148   : > { %s3089_s21 = scalar_lea.vmem %s3623_s3, 64  ;;  %s3214_s16 = smov [#allocation2]  }
 0x149   : > { %p3090_p4 = scmp.ne.s32.totalorder %s3623_s3, %s3089_s21  ;;  %s3094_s25 = sshll.u32 %s3214_s16, 4  ;;  %s3095_s25 = int_to_ptr.vmem [resolvable:$false] %s3094_s25 }
 0x14a   : > { %s3096_s19 = scalar_lea.vmem %s3095_s25, 128  ;;  %p3097_p10 = scmp.lt.s32.totalorder %s3623_s3, %s3095_s25 }
 0x14b   : > { %p3092_p13 = pnand %p3090_p4, %p3076_p8  ;;  %p3098_p1 = scmp.lt.s32.totalorder %s3096_s19, %s3089_s21 }
 0x14d   : > { %p3093_p11 = pneg %p3092_p13  ;;  %p3099_p3 = por %p3098_p1, %p3097_p10 }
 0x14f   : > { %p3100_p2 = pnand %p3099_p3, %p3093_p11 }
 0x151   : > { %3103 = shalt.err (!%p3100_p2)
}
 0x152   : > { %2551 = dma.hbm_to_vmem [thread:$0]  (!%p3627_p12), %s3621_s15, 64, %s3623_s3, %s498_s13  }
 0x153   : > { %s3932_s14 = sld [smem:[#allocation34_spill]] }
 0x159   : > { %p3933_p0 = scmp.ne.s32.totalorder %s3932_s14, 0 }
 0x15a   : > { %s3659_s17 = sand.u32 (!%p3933_p0), 1, %s3186_s26  }
 0x15b   : > { %517 = sbr.rel (%p3933_p0) target bundleno = 3734 (0xe96), region = 72  ;;  %s2187_s20 = sshll.u32 (!%p3933_p0), %s3659_s17, 2 }
 0x15c   : > { %s520_s24 = scalar_lea.sflag (!%p3933_p0), [#allocation3], %s3659_s17  ;;  %s523_s21 = scalar_lea.vmem (!%p3933_p0), [#allocation2], %s2187_s20 }
 0x162   : > { %3149 = dma.done.wait (%p3602_p6), %s520_s24, 64  }
 0x163   : > { %3151 = vsyncadd (%p3602_p6), %s520_s24, 4294967232  ;;  %s3934_s15 = sld [smem:[#allocation33_spill]] }
 0x169   : > { %p3935_p10 = scmp.eq.s32.totalorder %s3934_s15, 0 }
 0x16b   : > { %3153 = dma.done.wait (%p3935_p10), [#allocation6], 32   ;;  %p3936_p11 = pmov %p3935_p10 }
 0x16c   : > { %p3937_p12 = pmov %p3935_p10 }
 0x16d   : > { %3155 = vsyncadd (%p3936_p11), [#allocation6], 4294967264 }
 0x16e   : > { %3157 = dma.done.wait (%p3937_p12), [#allocation9], 3120   ;;  %p3938_p8 = pmov %p3935_p10 }
 0x170   : > { %3159 = vsyncadd (%p3938_p8), [#allocation9], 4294964176  ;;  %p3939_p5 = pmov %p3938_p8 }
 0x172   : > { %3161 = dma.done.wait (%p3939_p5), [#allocation12], 1040   ;;  %p3940_p7 = pmov %p3939_p5 }
 0x173   : > { %p3941_p6 = pmov %p3939_p5 }
 0x174   : > { %3163 = vsyncadd (%p3940_p7), [#allocation12], 4294966256 }
 0x175   : > { %3165 = dma.done.wait (%p3941_p6), [#allocation15], 32   ;;  %p3942_p9 = pmov %p3939_p5 }
 0x176   : > { %p3943_p4 = pmov %p3939_p5 }
 0x177   : > { %3167 = vsyncadd (%p3942_p9), [#allocation15], 4294967264 }
 0x178   : > { %3169 = dma.done.wait (%p3943_p4), [#allocation18], 2080   ;;  %p3944_p13 = pmov %p3943_p4 }
 0x179   : > { %p3945_p1 = pmov %p3943_p4 }
 0x17a   : > { %3171 = vsyncadd (%p3944_p13), [#allocation18], 4294965216 }
 0x17b   : > { %3173 = dma.done.wait (%p3945_p1), [#allocation21], 2064   ;;  %p3946_p3 = pmov %p3945_p1 }
 0x17c   : > { %v615_v0 = vld [vmem:[%s523_s21] sm:$0xf]  ;;  %v2638_v2 = vld [vmem:[#allocation8 + $0x4] ss:$12 sps:$4 sm:$0xff]   ;;  %v2640_v3 = vld [vmem:[#allocation8] ss:$12 sps:$4 sm:$0xff]   ;;  %v680_v42 = vlaneseq }
 0x17d   : > { %3175 = vsyncadd (%p3946_p3), [#allocation21], 4294965232  ;;  %v616_v1 = vunpack.c.l.bf16 %v615_v0  ;;  %v3215_v4 = vmov 0.0   ;;  %v2641_v5 = vld [vmem:[#allocation8 + $0x8] ss:$12 sps:$4 sm:$0xff]   ;;  %823 = vmatprep.subr.bf16.mxu0 %v2638_v2  ;;  %v3216_v26 = vmov 0  }
 0x17e   : > { %2346 = vmatprep.subr.bf16.mxu1 %v3215_v4  ;;  %v2642_v6 = vld [vmem:[#allocation8 + $0x1c] ss:$12 sps:$4 sm:$0xff]   ;;  %v2644_v7 = vld [vmem:[#allocation8 + $0x18] ss:$12 sps:$4 sm:$0xff]   ;;  %v2645_v8 = vld [vmem:[#allocation8 + $0x20] ss:$12 sps:$4 sm:$0xff]   ;;  %824 = vmatpush1.bf16.msra.mxu0 %v2640_v3 }
 0x17f   : > { %619 = vadd.xlane.f32.xlu0 %v616_v1  ;;  %v2646_v9 = vld [vmem:[#allocation8 + $0x34] ss:$12 sps:$4 sm:$0xff]   ;;  %2347 = vmatpush3.bf16.msra.mxu1 %v2641_v5  ;;  %v2648_v14 = vld [vmem:[#allocation8 + $0x30] ss:$12 sps:$4 sm:$0xff]   ;;  %v2649_v15 = vld [vmem:[#allocation8 + $0x38] ss:$12 sps:$4 sm:$0xff]  }
 0x180   : > { %825 = vmatprep.subr.bf16.mxu0 %v2642_v6  ;;  %2348 = vmatprep.subr.bf16.mxu1 %v3215_v4  ;;  %v2650_v16 = vld [vmem:[#allocation8 + $0x4c] ss:$12 sps:$4 sm:$0xff]   ;;  %v2652_v17 = vld [vmem:[#allocation8 + $0x48] ss:$12 sps:$4 sm:$0xff]   ;;  %v2653_v18 = vld [vmem:[#allocation8 + $0x50] ss:$12 sps:$4 sm:$0xff]  }
 0x181   : > { %v2654_v19 = vld [vmem:[#allocation8 + $0x64] ss:$12 sps:$4 sm:$0xff]   ;;  %v2656_v20 = vld [vmem:[#allocation8 + $0x60] ss:$12 sps:$4 sm:$0xff]   ;;  %v2657_v21 = vld [vmem:[#allocation8 + $0x68] ss:$12 sps:$4 sm:$0xff]   ;;  %855 = vmatprep.mubr.bf16.mxu0 %v3216_v26 }
 0x182   : > { %826 = vmatpush1.bf16.msra.mxu0 %v2644_v7  ;;  %v2658_v22 = vld [vmem:[#allocation8 + $0x7c] ss:$12 sps:$4 sm:$0xff]   ;;  %v2660_v23 = vld [vmem:[#allocation8 + $0x78] ss:$12 sps:$4 sm:$0xff]   ;;  %v2661_v24 = vld [vmem:[#allocation8 + $0x80] ss:$12 sps:$4 sm:$0xff]  }
 0x183   : > { %2349 = vmatpush3.bf16.msra.mxu1 %v2645_v8  ;;  %827 = vmatprep.subr.bf16.mxu0 %v2646_v9  ;;  %v2662_v25 = vld [vmem:[#allocation8 + $0x94] ss:$12 sps:$4 sm:$0xff]   ;;  %vm3217_vm0 = vmmov 0   ;;  %v2664_v27 = vld [vmem:[#allocation8 + $0x90] ss:$12 sps:$4 sm:$0xff]   ;;  %v3714_v43 = vshrl.u32 %v680_v42, 7 }
 0x184   : > { %2350 = vmatprep.subr.bf16.mxu1 %v3215_v4  ;;  %2362 = vmatprep.mubr.msk.bf16.mxu1 %vm3217_vm0, %v3215_v4  ;;  %v2665_v28 = vld [vmem:[#allocation8 + $0x98] ss:$12 sps:$4 sm:$0xff]   ;;  %v2668_v30 = vld [vmem:[#allocation8 + $0xa8] ss:$12 sps:$4 sm:$0xff]   ;;  %v2669_v31 = vld [vmem:[#allocation8 + $0xb0] ss:$12 sps:$4 sm:$0xff]  }
 0x185   : > { %v2666_v29 = vld [vmem:[#allocation8 + $0xac] ss:$12 sps:$4 sm:$0xff]   ;;  %v2201_v36 = vld [vmem:[#allocation5] ss:$0 sm:$0xff]  ;;  %v2202_v38 = vld [vmem:[#allocation7] ss:$0 sm:$0xff] }
 0x186   : > { %828 = vmatpush1.bf16.msra.mxu0 %v2648_v14  ;;  %v686_v44 = vsub.s32 1, %v3714_v43  ;;  %v678_v45 = vld [vmem:[#allocation10] sm:$0x7]  ;;  %v690_v46 = vsub.s32 2, %v3714_v43  ;;  %v682_v48 = vsub.s32 0, %v3714_v43  ;;  %vm919_vm1 = vcmask 261120  }
 0x187   : > { %2351 = vmatpush3.bf16.msra.mxu1 %v2649_v15  ;;  %829 = vmatprep.subr.bf16.mxu0 %v2650_v16  ;;  %s3218_s1 = smov 96   ;;  %vm985_vm2 = vcmask 1043456   ;;  %v3741_v3 = vand.u32 127, %v680_v42  ;;  %vm968_vm4 = vcmask 64512   ;;  %s3219_s3 = smov 64  }
 0x188   : > { %2352 = vmatprep.subr.bf16.mxu1 %v3215_v4  ;;  %v687_v47 = vrot.slane %v678_v45, %v686_v44  ;;  %v691_v53 = vrot.slane %v678_v45, %v690_v46  ;;  %v683_v59 = vrot.slane %v678_v45, %v682_v48  ;;  %s3220_s30 = smov 32   ;;  %s2284_s13 = sshll.u32 %s3934_s15, 6 }
 0x189   : > { %vm908_vm3 = vcmp.gt.s32.totalorder %v3741_v3, %v3714_v43  ;;  %s613_s16 = scalar_lea.vmem [#allocation23], %s2187_s20  ;;  %s3947_s24 = sld [smem:[#allocation38_spill]] }
 0x18a   : > { %830 = vmatpush1.bf16.msra.mxu0 %v2652_v17  ;;  %v2670_v17 = vld [vmem:[#allocation11] sm:$0xff]   ;;  %s1985_s25 = sshll.u32 %s613_s16, 4  ;;  %p3948_p0 = scmp.ne.s32.totalorder %s3928_s22, 0  ;;  %s3842_s25 = int_to_ptr.vmem [resolvable:$true] %s1985_s25 }
 0x18b   : > { %2353 = vmatpush3.bf16.msra.mxu1 %v2653_v18  ;;  %831 = vmatprep.subr.bf16.mxu0 %v2654_v19  ;;  %s3221_s20 = smov [#allocation23]  }
 0x18c   : > { %2354 = vmatprep.subr.bf16.mxu1 %v3215_v4  ;;  %s3108_s15 = sshll.u32 %s3221_s20, 4  ;;  %s3109_s15 = int_to_ptr.vmem [resolvable:$false] %s3108_s15 }
 0x18d   : > { %p3111_p12 = scmp.lt.s32.totalorder %s3842_s25, %s3109_s15 }
 0x18e   : > { %832 = vmatpush1.bf16.msra.mxu0 %v2656_v20 }
 0x18f   : > { %2355 = vmatpush3.bf16.msra.mxu1 %v2657_v21  ;;  %833 = vmatprep.subr.bf16.mxu0 %v2658_v22  ;;  %s3840_s21 = scalar_lea.hbm %s3947_s24, %s2284_s13 }
 0x190   : > { %2356 = vmatprep.subr.bf16.mxu1 %v3215_v4 }
 0x192   : > { %834 = vmatpush1.bf16.msra.mxu0 %v2660_v23 }
 0x193   : > { %2357 = vmatpush3.bf16.msra.mxu1 %v2661_v24  ;;  %835 = vmatprep.subr.bf16.mxu0 %v2662_v25 }
 0x194   : > { %2358 = vmatprep.subr.bf16.mxu1 %v3215_v4 }
 0x196   : > { %836 = vmatpush1.bf16.msra.mxu0 %v2664_v27 }
 0x197   : > { %2359 = vmatpush3.bf16.msra.mxu1 %v2665_v28  ;;  %837 = vmatprep.subr.bf16.mxu0 %v2666_v29  ;;  %v2671_v29 = vld [vmem:[#allocation11 + $0x8] sm:$0xff]  }
 0x198   : > { %2360 = vmatprep.subr.bf16.mxu1 %v3215_v4 }
 0x19a   : > { %838 = vmatpush1.bf16.msra.mxu0 %v2668_v30 }
 0x19b   : > { %2361 = vmatpush3.bf16.msra.mxu1 %v2669_v31  ;;  %2378 = vmatprep.subr.bf16.mxu0 %v3215_v4 }
 0x19c   : > { %2366 = vmatprep.subr.bf16.mxu1 %v3215_v4 }
 0x20c   : > { %v620_v10 = vpop.xlane.xlu0 %619 }
 0x20d   : > { %v622_v11 = vmul.f32 0.0078125, %v620_v10 }
 0x20f   : > { %v623_v12 = vsub.f32 %v616_v1, %v622_v11 }
 0x211   : > { %v624_v13 = vmul.f32 %v623_v12, %v623_v12 }
 0x213   : > { %625 = vadd.xlane.f32.xlu0 %v624_v13 }
 0x2a0   : > { %v626_v32 = vpop.xlane.xlu0 %625 }
 0x2a1   : > { %v627_v33 = vmul.f32 0.0078125, %v626_v32 }
 0x2a3   : > { %v628_v34 = vadd.f32 1e-12, %v627_v33 }
 0x2a5   : > { %2718 = vrsqrt.f32 %v628_v34 }
 0x2af   : > { %v2719_v35 = vpop.eup %2718 }
 0x2b0   : > { %v630_v37 = vmul.f32 %v2719_v35, %v623_v12 }
 0x2b2   : > { %v637_v39 = vmul.f32 %v2201_v36, %v630_v37 }
 0x2b4   : > { %v3706_v40 = vadd.f32 %v2202_v38, %v637_v39 }
 0x2b6   : > { %v645_v41 = vpack.c.bf16 %v3706_v40, %v3706_v40 }
 0x2b8   : > { %856 = vmatmul.mubr.bf16.vlgmr.msra.gmra.mrb[0].mxu0 %v645_v41  ;;  %2363 = vmatmul.mubr.bf16.vlgmr.msra.gmra.mrb[0].mxu1 %v645_v41 }
 0x2b9   : > { %2368 = vmatprep.mubr.msk.bf16.mxu1 %vm3217_vm0, %v3215_v4  ;;  %2382 = vmatprep.mubr.msk.bf16.mxu0 %vm3217_vm0, %v3215_v4 }
 0x2ba   : > { %2379 = vmatpush3.bf16.msra.mxu0 %v2670_v17 }
 0x2bb   : > { %2380 = vmatprep.subr.bf16.mxu0 %v3215_v4 }
 0x2be   : > { %2381 = vmatpush3.bf16.msra.mxu0 %v2671_v29  ;;  %v2673_v29 = vld [vmem:[#allocation11 + $0x18] sm:$0xff]  }
 0x2bf   : > { %2392 = vmatprep.subr.bf16.mxu0 %v3215_v4 }
 0x38b   : > { %v857_v49 = vpop.f32.mrb[0].mxu0  ;;  %v898_v50 = vpop.f32.mrb[0].mxu1 }
 0x38c   : > { %v859_v51 = vpop.f32.mrb[1].mxu0  ;;  %v2364_v52 = vpop.f32.mrb[1].mxu1  ;;  %v899_v61 = vadd.f32 %v898_v50, %v691_v53  ;;  %v858_v63 = vadd.f32 %v857_v49, %v683_v59 }
 0x38d   : > { %v860_v54 = vadd.f32 %v859_v51, %v687_v47  ;;  %v861_v55 = vpop.f32.mrb[2].mxu0  ;;  %v901_v56 = vpop.f32.mrb[2].mxu1 }
 0x38e   : > { %v862_v57 = vpop.f32.mrb[3].mxu0  ;;  %v2365_v58 = vpop.f32.mrb[3].mxu1  ;;  %v3730_v0 = vpack.c.bf16 %v899_v61, %v899_v61  ;;  %v3732_v1 = vpack.c.bf16 %v858_v63, %v858_v63 }
 0x38f   : > { %v3723_v60 = vpack.c.bf16 %v860_v54, %v860_v54 }
 0x390   : > { %v987_v2 = vsel %vm985_vm2, %v3730_v0, 0 }
 0x391   : > { %1094 = vrot.lane.b32.xlu0 %v3723_v60, %s3218_s1  ;;  %v924_v62 = vsel %vm919_vm1, %v3723_v60, 0 }
 0x392   : > { %2367 = vmatpush3.bf16.xpose.msra.mxu1 %v924_v62 }
 0x393   : > { %2372 = vmatprep.subr.bf16.mxu1 %v3215_v4 }
 0x399   : > { %2369 = vmatmul.mubr.msk.bf16.vlgmr.msra.gmra.mrb[4].mxu1 %vm919_vm1, %v3732_v1 }
 0x39a   : > { %2373 = vmatpush3.bf16.msra.mxu1 %v987_v2  ;;  %2374 = vmatprep.mubr.msk.bf16.mxu1 %vm3217_vm0, %v3215_v4 }
 0x39b   : > { %2386 = vmatprep.subr.bf16.mxu1 %v3215_v4 }
 0x403   : > { %v1095_v21 = vpop.permute.xlu0 %1094 }
 0x404   : > { %v1100_v24 = vsel %vm919_vm1, %v1095_v21, 0 }
 0x46c   : > { %v960_v5 = vpop.f32.mrb[4].mxu1 }
 0x46d   : > { %v966_v6 = vmul.f32 0.17677669, %v960_v5  ;;  %v2370_v7 = vpop.f32.mrb[5].mxu1 }
 0x46e   : > { %v963_v8 = vpop.f32.mrb[6].mxu1 }
 0x46f   : > { %v2371_v9 = vpop.f32.mrb[7].mxu1  ;;  %v967_v10 = vsel %vm908_vm3, -1e+30, %v966_v6 }
 0x470   : > { %v969_v11 = vsel %vm968_vm4, %v967_v10, -inf }
 0x471   : > { %970 = vmax.xlane.f32.xlu1 %v969_v11 }
 0x4fe   : > { %v971_v12 = vpop.xlane.xlu1 %970 }
 0x4ff   : > { %v972_v13 = vsub.f32 %v967_v10, %v971_v12 }
 0x501   : > { %v973_v14 = vmul.f32 1.442695, %v972_v13 }
 0x503   : > { %2720 = vpow2.f32 %v973_v14 }
 0x50d   : > { %v2721_v15 = vpop.eup %2720 }
 0x50e   : > { %v975_v16 = vsel %vm968_vm4, %v2721_v15, 0.0 }
 0x50f   : > { %976 = vadd.xlane.f32.xlu1 %v975_v16 }
 0x520   : > { %1091 = vrot.lane.b32.xlu1 %v3732_v1, %s3218_s1 }
 0x524   : > { %1268 = vrot.lane.b32.xlu1 %v3723_v60, %s3219_s3 }
 0x528   : > { %1266 = vrot.lane.b32.xlu1 %v3732_v1, %s3219_s3 }
 0x59c   : > { %v977_v18 = vpop.xlane.xlu1 %976 }
 0x59d   : > { %2722 = vrcp.f32 %v977_v18 }
 0x5a0   : > { %v1092_v23 = vpop.permute.xlu1 %1091 }
 0x5a4   : > { %v1269_v25 = vpop.permute.xlu1 %1268 }
 0x5a5   : > { %v1274_v27 = vsel %vm919_vm1, %v1269_v25, 0 }
 0x5a7   : > { %v2723_v19 = vpop.eup %2722 }
 0x5a8   : > { %v979_v20 = vmul.f32 %v2723_v19, %v2721_v15  ;;  %v1267_v28 = vpop.permute.xlu1 %1266 }
 0x5aa   : > { %v980_v22 = vpack.c.bf16 %v979_v20, %v979_v20 }
 0x5ac   : > { %2375 = vmatmul.mubr.msk.bf16.vlgmr.msra.gmra.mrb[8].mxu1 %vm968_vm4, %v980_v22 }
 0x5ad   : > { %2387 = vmatpush3.bf16.xpose.msra.mxu1 %v1100_v24  ;;  %2388 = vmatprep.mubr.msk.bf16.mxu1 %vm3217_vm0, %v3215_v4 }
 0x5ae   : > { %2406 = vmatprep.subr.bf16.mxu1 %v3215_v4 }
 0x5b4   : > { %2389 = vmatmul.mubr.msk.bf16.vlgmr.msra.gmra.mrb[12].mxu1 %vm919_vm1, %v1092_v23 }
 0x5b5   : > { %2407 = vmatpush3.bf16.xpose.msra.mxu1 %v1274_v27  ;;  %2408 = vmatprep.mubr.msk.bf16.mxu1 %vm3217_vm0, %v3215_v4 }
 0x5b6   : > { %2412 = vmatprep.subr.bf16.mxu1 %v3215_v4 }
 0x5bc   : > { %2409 = vmatmul.mubr.msk.bf16.vlgmr.msra.gmra.mrb[16].mxu1 %vm919_vm1, %v1267_v28  ;;  %v2672_v28 = vld [vmem:[#allocation11 + $0x10] sm:$0xff]  }
 0x5bd   : > { %2414 = vmatprep.mubr.msk.bf16.mxu1 %vm3217_vm0, %v3215_v4 }
 0x67f   : > { %v1023_v30 = vpop.f32.mrb[8].mxu1 }
 0x680   : > { %v1029_v31 = vpack.c.bf16 %v1023_v30, %v1023_v30  ;;  %v2376_v32 = vpop.f32.mrb[9].mxu1 }
 0x681   : > { %v1026_v33 = vpop.f32.mrb[10].mxu1 }
 0x682   : > { %v2377_v34 = vpop.f32.mrb[11].mxu1  ;;  %2383 = vmatmul.mubr.msk.bf16.vlgmr.msra.gmra.mrb[4].mxu0 %vm919_vm1, %v1029_v31 }
 0x683   : > { %2394 = vmatprep.mubr.msk.bf16.mxu0 %vm3217_vm0, %v3215_v4 }
 0x687   : > { %v1136_v35 = vpop.f32.mrb[12].mxu1 }
 0x688   : > { %v2390_v36 = vpop.f32.mrb[13].mxu1  ;;  %v1142_v57 = vmul.f32 0.17677669, %v1136_v35  ;;  %v2674_v35 = vld [vmem:[#allocation11 + $0x20] sm:$0xff]  }
 0x689   : > { %v1139_v37 = vpop.f32.mrb[14].mxu1 }
 0x68a   : > { %v2391_v38 = vpop.f32.mrb[15].mxu1  ;;  %v1143_v58 = vsel %vm908_vm3, -1e+30, %v1142_v57 }
 0x68b   : > { %v1144_v59 = vsel %vm968_vm4, %v1143_v58, -inf }
 0x68f   : > { %v1310_v39 = vpop.f32.mrb[16].mxu1 }
 0x690   : > { %v1316_v41 = vmul.f32 0.17677669, %v1310_v39  ;;  %v2410_v42 = vpop.f32.mrb[17].mxu1 }
 0x691   : > { %v1313_v45 = vpop.f32.mrb[18].mxu1 }
 0x692   : > { %v2411_v46 = vpop.f32.mrb[19].mxu1  ;;  %v1317_v47 = vsel %vm908_vm3, -1e+30, %v1316_v41  ;;  %v2675_v41 = vld [vmem:[#allocation11 + $0x28] sm:$0xff]  }
 0x693   : > { %v1318_v49 = vsel %vm968_vm4, %v1317_v47, -inf }
 0x694   : > { %1319 = vmax.xlane.f32.xlu0 %v1318_v49 }
 0x6aa   : > { %1330 = vrot.lane.b32.xlu0 %v3730_v0, %s3219_s3  ;;  %s3104_s3 = scalar_lea.vmem %s3842_s25, 64 }
 0x6ab   : > { %p3105_p2 = scmp.ne.s32.totalorder %s3842_s25, %s3104_s3 }
 0x6ad   : > { %p3106_p10 = pnand %p3105_p2, %p3948_p0 }
 0x6ae   : > { %1439 = vrot.lane.b32.xlu0 %v3732_v1, %s3220_s30 }
 0x6af   : > { %p3107_p11 = pneg %p3106_p10 }
 0x721   : > { %v1320_v50 = vpop.xlane.xlu0 %1319 }
 0x722   : > { %v1321_v51 = vsub.f32 %v1317_v47, %v1320_v50  ;;  %v2676_v50 = vld [vmem:[#allocation11 + $0x30] sm:$0xff]  }
 0x724   : > { %v1322_v52 = vmul.f32 1.442695, %v1321_v51 }
 0x725   : > { %v1331_v53 = vpop.permute.xlu0 %1330 }
 0x726   : > { %2724 = vpow2.f32 %v1322_v52  ;;  %v1336_v54 = vsel %vm985_vm2, %v1331_v53, 0  ;;  %v2677_v52 = vld [vmem:[#allocation11 + $0x38] sm:$0xff]  }
 0x727   : > { %2413 = vmatpush3.bf16.msra.mxu1 %v1336_v54 }
 0x728   : > { %2426 = vmatprep.subr.bf16.mxu1 %v3215_v4 }
 0x730   : > { %v2725_v55 = vpop.eup %2724 }
 0x731   : > { %v1324_v56 = vsel %vm968_vm4, %v2725_v55, 0.0 }
 0x732   : > { %1325 = vadd.xlane.f32.xlu1 %v1324_v56 }
 0x743   : > { %1441 = vrot.lane.b32.xlu1 %v3723_v60, %s3220_s30  ;;  %v1440_v60 = vpop.permute.xlu0 %1439 }
 0x767   : > { %1145 = vmax.xlane.f32.xlu1 %v1144_v59 }
 0x7bf   : > { %v1326_v61 = vpop.xlane.xlu1 %1325 }
 0x7c0   : > { %2726 = vrcp.f32 %v1326_v61 }
 0x7c3   : > { %v1442_v1 = vpop.permute.xlu1 %1441 }
 0x7c4   : > { %v1447_v5 = vsel %vm919_vm1, %v1442_v1, 0 }
 0x7ca   : > { %v2727_v62 = vpop.eup %2726 }
 0x7cb   : > { %v1328_v63 = vmul.f32 %v2727_v62, %v2725_v55 }
 0x7cd   : > { %v1329_v2 = vpack.c.bf16 %v1328_v63, %v1328_v63 }
 0x7cf   : > { %2415 = vmatmul.mubr.msk.bf16.vlgmr.msra.gmra.mrb[20].mxu1 %vm968_vm4, %v1329_v2 }
 0x7d0   : > { %2427 = vmatpush3.bf16.xpose.msra.mxu1 %v1447_v5  ;;  %2428 = vmatprep.mubr.msk.bf16.mxu1 %vm3217_vm0, %v3215_v4  ;;  %v2678_v5 = vld [vmem:[#allocation17] ss:$8 sps:$4 sm:$0xff]  }
 0x7d7   : > { %2429 = vmatmul.mubr.msk.bf16.vlgmr.msra.gmra.mrb[24].mxu1 %vm919_vm1, %v1440_v60  ;;  %v2683_v60 = vld [vmem:[#allocation17 + $0x14] ss:$8 sps:$4 sm:$0xff]  }
 0x7d8   : > { %1780 = vmatprep.mubr.bf16.mxu1 %v3216_v26 }
 0x7f4   : > { %v1146_v6 = vpop.xlane.xlu1 %1145 }
 0x7f5   : > { %v1147_v7 = vsub.f32 %v1143_v58, %v1146_v6  ;;  %v2227_v58 = vld [vmem:[#allocation13] ss:$0 sm:$0xff] }
 0x7f6   : > { %v916_v59 = vadd.f32 %v2227_v58, %v3706_v40  ;;  %v2681_v6 = vld [vmem:[#allocation17 + $0x10] ss:$8 sps:$4 sm:$0xff]  }
 0x7f7   : > { %v1148_v8 = vmul.f32 1.442695, %v1147_v7  ;;  %v2686_v7 = vld [vmem:[#allocation17 + $0x24] ss:$8 sps:$4 sm:$0xff]  }
 0x7f9   : > { %2728 = vpow2.f32 %v1148_v8  ;;  %v2684_v8 = vld [vmem:[#allocation17 + $0x20] ss:$8 sps:$4 sm:$0xff]  }
 0x803   : > { %v2729_v9 = vpop.eup %2728 }
 0x804   : > { %v1150_v10 = vsel %vm968_vm4, %v2729_v9, 0.0 }
 0x805   : > { %1151 = vadd.xlane.f32.xlu0 %v1150_v10 }
 0x81b   : > { %1157 = vrot.lane.b32.xlu0 %v3730_v0, %s3218_s1  ;;  %s1972_s1 = scalar_lea.sflag [#allocation4], %s3659_s17 }
 0x892   : > { %v1152_v11 = vpop.xlane.xlu0 %1151 }
 0x893   : > { %2730 = vrcp.f32 %v1152_v11 }
 0x896   : > { %v1158_v12 = vpop.permute.xlu0 %1157 }
 0x897   : > { %v1163_v13 = vsel %vm985_vm2, %v1158_v12, 0  ;;  %v2689_v12 = vld [vmem:[#allocation17 + $0x34] ss:$8 sps:$4 sm:$0xff]  }
 0x898   : > { %2393 = vmatpush3.bf16.msra.mxu0 %v1163_v13  ;;  %v2687_v13 = vld [vmem:[#allocation17 + $0x30] ss:$8 sps:$4 sm:$0xff]  }
 0x899   : > { %2398 = vmatprep.subr.bf16.mxu0 %v3215_v4 }
 0x89d   : > { %v2731_v26 = vpop.eup %2730 }
 0x89e   : > { %v1154_v14 = vmul.f32 %v2731_v26, %v2729_v9  ;;  %v2692_v26 = vld [vmem:[#allocation17 + $0x44] ss:$8 sps:$4 sm:$0xff]  }
 0x8a0   : > { %v1155_v15 = vpack.c.bf16 %v1154_v14, %v1154_v14  ;;  %v2690_v14 = vld [vmem:[#allocation17 + $0x40] ss:$8 sps:$4 sm:$0xff]  }
 0x8a2   : > { %2395 = vmatmul.mubr.msk.bf16.vlgmr.msra.gmra.mrb[8].mxu0 %vm968_vm4, %v1155_v15  ;;  %v1372_v16 = vpop.f32.mrb[20].mxu1  ;;  %v2695_v15 = vld [vmem:[#allocation17 + $0x54] ss:$8 sps:$4 sm:$0xff]  }
 0x8a3   : > { %v2416_v17 = vpop.f32.mrb[21].mxu1  ;;  %2402 = vmatprep.mubr.msk.bf16.mxu0 %vm3217_vm0, %v3215_v4  ;;  %2399 = vmatpush3.bf16.msra.mxu0 %v2672_v28  ;;  %v1378_v42 = vpack.c.bf16 %v1372_v16, %v1372_v16  ;;  %v2693_v16 = vld [vmem:[#allocation17 + $0x50] ss:$8 sps:$4 sm:$0xff]  }
 0x8a4   : > { %v1375_v18 = vpop.f32.mrb[22].mxu1  ;;  %2400 = vmatprep.subr.bf16.mxu0 %v3215_v4  ;;  %v2698_v17 = vld [vmem:[#allocation17 + $0x64] ss:$8 sps:$4 sm:$0xff]   ;;  %v2708_v28 = vld [vmem:[#allocation20 + $0x58] sm:$0xff]  }
 0x8a5   : > { %v2417_v19 = vpop.f32.mrb[23].mxu1  ;;  %v2696_v18 = vld [vmem:[#allocation17 + $0x60] ss:$8 sps:$4 sm:$0xff]  }
 0x8a6   : > { %v2701_v19 = vld [vmem:[#allocation17 + $0x74] ss:$8 sps:$4 sm:$0xff]  }
 0x8a7   : > { %2401 = vmatpush3.bf16.msra.mxu0 %v2673_v29  ;;  %v2709_v29 = vld [vmem:[#allocation20 + $0x18] sm:$0xff]  }
 0x8a8   : > { %2418 = vmatprep.subr.bf16.mxu0 %v3215_v4 }
 0x8aa   : > { %v1483_v20 = vpop.f32.mrb[24].mxu1 }
 0x8ab   : > { %v1489_v21 = vmul.f32 0.17677669, %v1483_v20  ;;  %v2430_v22 = vpop.f32.mrb[25].mxu1  ;;  %v2699_v20 = vld [vmem:[#allocation17 + $0x70] ss:$8 sps:$4 sm:$0xff]  }
 0x8ac   : > { %v1486_v23 = vpop.f32.mrb[26].mxu1  ;;  %v2703_v22 = vld [vmem:[#allocation20] sm:$0xff]  }
 0x8ad   : > { %v2431_v24 = vpop.f32.mrb[27].mxu1  ;;  %v1490_v25 = vsel %vm908_vm3, -1e+30, %v1489_v21  ;;  %v2702_v21 = vld [vmem:[#allocation20 + $0x40] sm:$0xff]   ;;  %v2704_v23 = vld [vmem:[#allocation20 + $0x48] sm:$0xff]  }
 0x8ae   : > { %v1491_v27 = vsel %vm968_vm4, %v1490_v25, -inf  ;;  %v2705_v24 = vld [vmem:[#allocation20 + $0x8] sm:$0xff]  }
 0x8af   : > { %1492 = vmax.xlane.f32.xlu1 %v1491_v27  ;;  %v2707_v27 = vld [vmem:[#allocation20 + $0x10] sm:$0xff]  }
 0x93c   : > { %v1493_v30 = vpop.xlane.xlu1 %1492 }
 0x93d   : > { %v1494_v31 = vsub.f32 %v1490_v25, %v1493_v30  ;;  %v2706_v25 = vld [vmem:[#allocation20 + $0x50] sm:$0xff]   ;;  %v2710_v30 = vld [vmem:[#allocation20 + $0x60] sm:$0xff]  }
 0x93f   : > { %v1495_v32 = vmul.f32 1.442695, %v1494_v31  ;;  %v2711_v31 = vld [vmem:[#allocation20 + $0x20] sm:$0xff]  }
 0x941   : > { %2732 = vpow2.f32 %v1495_v32  ;;  %v2712_v32 = vld [vmem:[#allocation20 + $0x68] sm:$0xff]  }
 0x94b   : > { %v2733_v33 = vpop.eup %2732 }
 0x94c   : > { %v1497_v34 = vsel %vm968_vm4, %v2733_v33, 0.0 }
 0x94d   : > { %1498 = vadd.xlane.f32.xlu1 %v1497_v34 }
 0x95e   : > { %1503 = vrot.lane.b32.xlu1 %v3730_v0, %s3220_s30  ;;  %s3110_s30 = scalar_lea.vmem %s3109_s15, 128 }
 0x95f   : > { %p3112_p8 = scmp.lt.s32.totalorder %s3110_s30, %s3104_s3 }
 0x961   : > { %p3113_p5 = por %p3112_p8, %p3111_p12 }
 0x963   : > { %p3114_p7 = pnand %p3113_p5, %p3107_p11 }
 0x975   : > { %v1199_v3 = vpop.f32.mrb[8].mxu0 }
 0x976   : > { %v1205_v36 = vpack.c.bf16 %v1199_v3, %v1199_v3  ;;  %v2396_v37 = vpop.f32.mrb[9].mxu0 }
 0x977   : > { %v1202_v38 = vpop.f32.mrb[10].mxu0  ;;  %v2248_v37 = vld [vmem:[#allocation14] ss:$0 sm:$0xff] }
 0x978   : > { %v2397_v39 = vpop.f32.mrb[11].mxu0  ;;  %2403 = vmatmul.mubr.msk.bf16.vlgmr.msra.gmra.mrb[4].mxu0 %vm919_vm1, %v1205_v36 }
 0x979   : > { %2419 = vmatpush3.bf16.msra.mxu0 %v2674_v35  ;;  %2422 = vmatprep.mubr.msk.bf16.mxu0 %vm3217_vm0, %v3215_v4  ;;  %v2249_v39 = vld [vmem:[#allocation16] ss:$0 sm:$0xff] }
 0x97a   : > { %2420 = vmatprep.subr.bf16.mxu0 %v3215_v4 }
 0x97d   : > { %2421 = vmatpush3.bf16.msra.mxu0 %v2675_v41 }
 0x97e   : > { %2432 = vmatprep.subr.bf16.mxu0 %v3215_v4 }
 0x984   : > { %2423 = vmatmul.mubr.msk.bf16.vlgmr.msra.gmra.mrb[4].mxu0 %vm919_vm1, %v1378_v42 }
 0x985   : > { %2434 = vmatprep.mubr.msk.bf16.mxu0 %vm3217_vm0, %v3215_v4 }
 0x9da   : > { %v1499_v0 = vpop.xlane.xlu1 %1498 }
 0x9db   : > { %2734 = vrcp.f32 %v1499_v0 }
 0x9de   : > { %v1504_v45 = vpop.permute.xlu1 %1503 }
 0x9df   : > { %v1509_v46 = vsel %vm985_vm2, %v1504_v45, 0  ;;  %v2714_v45 = vld [vmem:[#allocation20 + $0x70] sm:$0xff]  }
 0x9e0   : > { %2433 = vmatpush3.bf16.msra.mxu0 %v1509_v46  ;;  %v2715_v46 = vld [vmem:[#allocation20 + $0x30] sm:$0xff]  }
 0x9e1   : > { %2438 = vmatprep.subr.bf16.mxu0 %v3215_v4 }
 0x9e5   : > { %v2735_v47 = vpop.eup %2734 }
 0x9e6   : > { %v1501_v49 = vmul.f32 %v2735_v47, %v2733_v33  ;;  %v2713_v33 = vld [vmem:[#allocation20 + $0x28] sm:$0xff]   ;;  %v2716_v47 = vld [vmem:[#allocation20 + $0x78] sm:$0xff]  }
 0x9e8   : > { %v1502_v51 = vpack.c.bf16 %v1501_v49, %v1501_v49  ;;  %v2717_v49 = vld [vmem:[#allocation20 + $0x38] sm:$0xff]  }
 0x9ea   : > { %2435 = vmatmul.mubr.msk.bf16.vlgmr.msra.gmra.mrb[12].mxu0 %vm968_vm4, %v1502_v51 }
 0x9eb   : > { %2439 = vmatpush3.bf16.msra.mxu0 %v2676_v50  ;;  %2442 = vmatprep.mubr.msk.bf16.mxu0 %vm3217_vm0, %v3215_v4  ;;  %v1656_v50 = vld [vmem:[#allocation19] sm:$0x3] }
 0x9ec   : > { %2440 = vmatprep.subr.bf16.mxu0 %v3215_v4  ;;  %v2680_v4 = vld [vmem:[#allocation17 + $0x4] ss:$8 sps:$4 sm:$0xff]   ;;  %v1661_v51 = vrot.slane %v1656_v50, %v682_v48  ;;  %v2266_v48 = vld [vmem:[#allocation22] ss:$0 sm:$0xff] }
 0x9ed   : > { %1748 = vmatprep.subr.bf16.mxu1 %v2680_v4 }
 0x9ee   : > { %1749 = vmatpush1.bf16.msra.mxu1 %v2678_v5 }
 0x9ef   : > { %2441 = vmatpush3.bf16.msra.mxu0 %v2677_v52  ;;  %1750 = vmatprep.subr.bf16.mxu1 %v2683_v60  ;;  %v1665_v52 = vrot.slane %v1656_v50, %v686_v44 }
 0x9f0   : > { %2324 = vmatprep.subr.bf16.mxu0 %v2702_v21 }
 0x9f2   : > { %1751 = vmatpush1.bf16.msra.mxu1 %v2681_v6 }
 0x9f3   : > { %1752 = vmatprep.subr.bf16.mxu1 %v2686_v7 }
 0x9f6   : > { %1753 = vmatpush1.bf16.msra.mxu1 %v2684_v8 }
 0x9f7   : > { %1754 = vmatprep.subr.bf16.mxu1 %v2689_v12 }
 0x9fa   : > { %1755 = vmatpush1.bf16.msra.mxu1 %v2687_v13 }
 0x9fb   : > { %1756 = vmatprep.subr.bf16.mxu1 %v2692_v26 }
 0x9fe   : > { %1757 = vmatpush1.bf16.msra.mxu1 %v2690_v14 }
 0x9ff   : > { %1758 = vmatprep.subr.bf16.mxu1 %v2695_v15 }
 0xa02   : > { %1759 = vmatpush1.bf16.msra.mxu1 %v2693_v16 }
 0xa03   : > { %1760 = vmatprep.subr.bf16.mxu1 %v2698_v17 }
 0xa06   : > { %1761 = vmatpush1.bf16.msra.mxu1 %v2696_v18 }
 0xa07   : > { %1762 = vmatprep.subr.bf16.mxu1 %v2701_v19 }
 0xa0a   : > { %1763 = vmatpush1.bf16.msra.mxu1 %v2699_v20 }
 0xabd   : > { %v1545_v53 = vpop.f32.mrb[12].mxu0 }
 0xabe   : > { %v1551_v54 = vpack.c.bf16 %v1545_v53, %v1545_v53  ;;  %v2436_v55 = vpop.f32.mrb[13].mxu0 }
 0xabf   : > { %v1548_v56 = vpop.f32.mrb[14].mxu0 }
 0xac0   : > { %v2437_v57 = vpop.f32.mrb[15].mxu0  ;;  %2443 = vmatmul.mubr.msk.bf16.vlgmr.msra.gmra.mrb[4].mxu0 %vm919_vm1, %v1551_v54 }
 0xac1   : > { %2325 = vmatpush3.bf16.msra.mxu0 %v2703_v22 }
 0xac2   : > { %2326 = vmatprep.subr.bf16.mxu0 %v2704_v23 }
 0xac5   : > { %2327 = vmatpush3.bf16.msra.mxu0 %v2705_v24 }
 0xac6   : > { %2328 = vmatprep.subr.bf16.mxu0 %v2706_v25 }
 0xac9   : > { %2329 = vmatpush3.bf16.msra.mxu0 %v2707_v27 }
 0xaca   : > { %2330 = vmatprep.subr.bf16.mxu0 %v2708_v28 }
 0xacd   : > { %2331 = vmatpush3.bf16.msra.mxu0 %v2709_v29 }
 0xace   : > { %2332 = vmatprep.subr.bf16.mxu0 %v2710_v30 }
 0xad1   : > { %2333 = vmatpush3.bf16.msra.mxu0 %v2711_v31 }
 0xad2   : > { %2334 = vmatprep.subr.bf16.mxu0 %v2712_v32 }
 0xad5   : > { %2335 = vmatpush3.bf16.msra.mxu0 %v2713_v33 }
 0xad6   : > { %2336 = vmatprep.subr.bf16.mxu0 %v2714_v45 }
 0xad9   : > { %2337 = vmatpush3.bf16.msra.mxu0 %v2715_v46 }
 0xada   : > { %2338 = vmatprep.subr.bf16.mxu0 %v2716_v47 }
 0xadd   : > { %2339 = vmatpush3.bf16.msra.mxu0 %v2717_v49 }
 0xb93   : > { %v1605_v61 = vpop.f32.mrb[4].mxu0 }
 0xb94   : > { %v2446_v62 = vadd.f32 %v1605_v61, %v916_v59  ;;  %v2444_v63 = vpop.f32.mrb[5].mxu0 }
 0xb95   : > { %v1608_v1 = vpop.f32.mrb[6].mxu0 }
 0xb96   : > { %1614 = vadd.xlane.f32.xlu0 %v2446_v62  ;;  %v2445_v2 = vpop.f32.mrb[7].mxu0 }
 0xc23   : > { %v1615_v9 = vpop.xlane.xlu0 %1614 }
 0xc24   : > { %v1616_v40 = vmul.f32 0.0078125, %v1615_v9 }
 0xc26   : > { %v1617_v10 = vsub.f32 %v2446_v62, %v1616_v40 }
 0xc28   : > { %v1618_v11 = vmul.f32 %v1617_v10, %v1617_v10 }
 0xc2a   : > { %1619 = vadd.xlane.f32.xlu1 %v1618_v11 }
 0xcb7   : > { %v1620_v34 = vpop.xlane.xlu1 %1619 }
 0xcb8   : > { %v1621_v3 = vmul.f32 0.0078125, %v1620_v34 }
 0xcba   : > { %v1622_v35 = vadd.f32 1e-12, %v1621_v3 }
 0xcbc   : > { %2736 = vrsqrt.f32 %v1622_v35 }
 0xcc6   : > { %v2737_v36 = vpop.eup %2736 }
 0xcc7   : > { %v1624_v38 = vmul.f32 %v2737_v36, %v1617_v10 }
 0xcc9   : > { %v1631_v41 = vmul.f32 %v2248_v37, %v1624_v38 }
 0xccb   : > { %v1638_v42 = vadd.f32 %v2249_v39, %v1631_v41 }
 0xccd   : > { %v1639_v0 = vpack.c.bf16 %v1638_v42, %v1638_v42 }
 0xccf   : > { %1781 = vmatmul.mubr.bf16.vlgmr.msra.gmra.mrb[28].mxu1 %v1639_v0 }
 0xda2   : > { %v1782_v53 = vpop.f32.mrb[28].mxu1 }
 0xda3   : > { %v1783_v54 = vadd.f32 %v1782_v53, %v1661_v51  ;;  %v1784_v55 = vpop.f32.mrb[29].mxu1 }
 0xda4   : > { %v1785_v56 = vadd.f32 %v1784_v55, %v1665_v52  ;;  %v1786_v57 = vpop.f32.mrb[30].mxu1 }
 0xda5   : > { %v1789_v58 = vmax.f32 %v1783_v54, 0.0  ;;  %v1787_v59 = vpop.f32.mrb[31].mxu1 }
 0xda6   : > { %v1790_v61 = vmax.f32 %v1785_v56, 0.0 }
 0xda7   : > { %v1791_v63 = vpack.c.bf16 %v1789_v58, %v1789_v58 }
 0xda8   : > { %v1792_v62 = vpack.c.bf16 %v1790_v61, %v1790_v61 }
 0xdaa   : > { %1960 = vmatprep.mubr.bf16.mxu0 %v1792_v62 }
 0xdab   : > { %1961 = vmatmul.mubr.bf16.vlgmr.msra.gmra.mrb[16].mxu0 %v1791_v63 }
 0xe7e   : > { %v2340_v1 = vpop.f32.mrb[16].mxu0 }
 0xe7f   : > { %v2341_v2 = vpop.f32.mrb[17].mxu0 }
 0xe80   : > { %v2342_v43 = vadd.f32 %v2341_v2, %v2340_v1  ;;  %v2343_v44 = vpop.f32.mrb[18].mxu0 }
 0xe81   : > { %v2344_v5 = vpop.f32.mrb[19].mxu0 }
 0xe82   : > { %v1963_v4 = vadd.f32 %v2342_v43, %v2266_v48 }
 0xe84   : > { %v1968_v60 = vadd.f32 %v1963_v4, %v1638_v42 }
 0xe86   : > { %v1969_v6 = vpack.c.bf16 %v1968_v60, %v1968_v60 }
 0xe88   : > { %1970 = vst [vmem:[%s613_s16] sm:$0xf] %v1969_v6 }
 0xe89   : > { %3117 = shalt.err (!%p3114_p7)
}
 0xe8a   : > { %s3118_s17 = scalar_lea.hbm %s3840_s21, 64  ;;  %s3122_s19 = scalar_lea.hbm %s3947_s24, 128 }
 0xe8b   : > { %p3119_p6 = scmp.ne.s32.totalorder %s3840_s21, %s3118_s17  ;;  %p3123_p13 = scmp.lt.u32.totalorder %s3840_s21, %s3947_s24 }
 0xe8c   : > { %p3124_p1 = scmp.lt.u32.totalorder %s3122_s19, %s3118_s17  ;;  %p3126_p2 = scmp.lt.u32.totalorder %s3118_s17, %s3840_s21 }
 0xe8d   : > { %p3120_p9 = pnand %p3119_p6, %p3948_p0 }
 0xe8e   : > { %p3125_p3 = por %p3124_p1, %p3123_p13 }
 0xe8f   : > { %p3121_p4 = pneg %p3120_p9 }
 0xe90   : > { %p3127_p10 = por %p3126_p2, %p3125_p3 }
 0xe92   : > { %p3128_p11 = pnand %p3127_p10, %p3121_p4 }
 0xe94   : > { %3131 = shalt.err (!%p3128_p11)
}
 0xe95   : > { %2509 = dma.vmem_to_hbm [thread:$0]  (%p3948_p0), %s3842_s25, 64, %s3840_s21, %s1972_s1  }
 0xe96 PF: > { %s3949_s3 = sld [smem:[#allocation32_spill]]  ;;  %p3950_p12 = scmp.ne.s32.totalorder %s3929_s23, 0 }
 0xe97   : > { %p3951_p8 = scmp.ge.s32.totalorder %s3194_s28, 2 }
 0xe99   : > { %p2553_p5 = pnand %p3951_p8, %p3950_p12 }
 0xe9c   : > { %s1997_s15 = sand.u32 1, %s3949_s3  }
 0xe9d   : > { %s1998_s30 = scalar_lea.sflag [#allocation4], %s1997_s15 }
 0xe9e   : > { %3177 = dma.done.wait (!%p2553_p5), %s1998_s30, 64  }
 0xe9f   : > { %3179 = vsyncadd (!%p2553_p5), %s1998_s30, 4294967232  ;;  %p32_p7 = scmp.ge.s32.totalorder %s3583_s18, 4   ;;  %s3952_s25 = smov %s3186_s26 }
 0xea0   : > { %s3953_s26 = smov %s3190_s27  ;;  %s3954_s27 = smov %s3594_s29 }
 0xea1   : > { %s3955_s28 = smov %s3583_s18  ;;  %34 = sbr.rel (!%p32_p7) target bundleno = 16 (0x10), region = 165 }
 0xea8   :  { %2003 = vsyncpa [#allocation3], 1 }
 0xea9   :  { %2005 = vsyncpa [#allocation3 + $0x1], 1 }
 0xeaa   :  { %2006 = vsyncpa [#allocation6], 1 }
 0xeab   :  { %2007 = vsyncpa [#allocation9], 1 }
 0xeac   :  { %2008 = vsyncpa [#allocation12], 1 }
 0xead   :  { %2009 = vsyncpa [#allocation15], 1 }
 0xeae   :  { %2010 = vsyncpa [#allocation18], 1 }
 0xeaf   :  { %2011 = vsyncpa [#allocation21], 1 }
 0xeb0   :  { %2012 = vsyncpa [#allocation4], 1 }
 0xeb1   :  { %2014 = vsyncpa [#allocation4 + $0x1], 1 }

</bundles_post_ra>
